<compile_context>
chip_gen: v7x
topology: tpu7x:2x2x1
jax: 0.10.0
libtpu: 0.0.40
codegen_flags: <defaults>
</compile_context>

<pallas_src>
import functools
import math

import jax
import jax.numpy as jnp
from jax.experimental import pallas as pl
from jax.experimental.pallas import tpu as pltpu


# ----------------------------------------------------------------------------
# shared math helpers (used both inside kernels and in the pure-JAX reference)
# ----------------------------------------------------------------------------
_GELU_C = 0.7978845608028654  # sqrt(2/pi)


def _gelu(x):
    return 0.5 * x * (1.0 + jnp.tanh(_GELU_C * (x + 0.044715 * x * x * x)))


def _layer_norm(x, gamma, beta, eps=1e-5):
    mean = jnp.mean(x, axis=-1, keepdims=True)
    c = x - mean
    var = jnp.mean(c * c, axis=-1, keepdims=True)
    return c * jax.lax.rsqrt(var + eps) * gamma + beta


# ----------------------------------------------------------------------------
# Kernel 1: token embedding (one-hot @ table on the MXU) + positional encoding
# ----------------------------------------------------------------------------
def _embed_pe_kernel(ids_ref, table_ref, pe_ref, out_ref):
    # ids_ref : (1, L, 1) int32 ; table_ref : (V, D) ; pe_ref : (L, D) ; out_ref : (1, L, D)
    ids = ids_ref[0]                                   # (L, 1)
    tab = table_ref[...]                               # (V, D)
    L = ids.shape[0]
    V = tab.shape[0]
    iota = jax.lax.broadcasted_iota(jnp.int32, (L, V), 1)
    one_hot = (ids == iota).astype(tab.dtype)          # (L, V)
    emb = jnp.dot(one_hot, tab, preferred_element_type=jnp.float32)   # (L, D)
    out_ref[0] = (emb + pe_ref[...]).astype(out_ref.dtype)


def embed_with_pe(ids, table, pe_slice):
    B, L = ids.shape
    V, D = table.shape
    ids3 = ids.astype(jnp.int32)[:, :, None]           # (B, L, 1)
    return pl.pallas_call(
        _embed_pe_kernel,
        out_shape=jax.ShapeDtypeStruct((B, L, D), jnp.float32),
        grid=(B,),
        in_specs=[
            pl.BlockSpec((1, L, 1), lambda b: (b, 0, 0)),
            pl.BlockSpec((V, D), lambda b: (0, 0)),
            pl.BlockSpec((L, D), lambda b: (0, 0)),
        ],
        out_specs=pl.BlockSpec((1, L, D), lambda b: (b, 0, 0)),
        compiler_params=pltpu.CompilerParams(dimension_semantics=("parallel",)),
    )(ids3, table, pe_slice)


# ----------------------------------------------------------------------------
# Kernel 2: fused q/k/v linear projections
# ----------------------------------------------------------------------------
def _qkv_proj_kernel(q_in, k_in, v_in, wq, bq, wk, bk, wv, bv, q_out, k_out, v_out):
    q_out[0] = (jnp.dot(q_in[0], wq[...], preferred_element_type=jnp.float32) + bq[...]).astype(q_out.dtype)
    k_out[0] = (jnp.dot(k_in[0], wk[...], preferred_element_type=jnp.float32) + bk[...]).astype(k_out.dtype)
    v_out[0] = (jnp.dot(v_in[0], wv[...], preferred_element_type=jnp.float32) + bv[...]).astype(v_out.dtype)


def qkv_projection(query, key, value, wq, bq, wk, bk, wv, bv):
    B, Lq, D = query.shape
    Lk = key.shape[1]
    return pl.pallas_call(
        _qkv_proj_kernel,
        out_shape=(
            jax.ShapeDtypeStruct((B, Lq, D), jnp.float32),
            jax.ShapeDtypeStruct((B, Lk, D), jnp.float32),
            jax.ShapeDtypeStruct((B, Lk, D), jnp.float32),
        ),
        grid=(B,),
        in_specs=[
            pl.BlockSpec((1, Lq, D), lambda b: (b, 0, 0)),
            pl.BlockSpec((1, Lk, D), lambda b: (b, 0, 0)),
            pl.BlockSpec((1, Lk, D), lambda b: (b, 0, 0)),
            pl.BlockSpec((D, D), lambda b: (0, 0)),
            pl.BlockSpec((1, D), lambda b: (0, 0)),
            pl.BlockSpec((D, D), lambda b: (0, 0)),
            pl.BlockSpec((1, D), lambda b: (0, 0)),
            pl.BlockSpec((D, D), lambda b: (0, 0)),
            pl.BlockSpec((1, D), lambda b: (0, 0)),
        ],
        out_specs=(
            pl.BlockSpec((1, Lq, D), lambda b: (b, 0, 0)),
            pl.BlockSpec((1, Lk, D), lambda b: (b, 0, 0)),
            pl.BlockSpec((1, Lk, D), lambda b: (b, 0, 0)),
        ),
        compiler_params=pltpu.CompilerParams(dimension_semantics=("parallel",)),
    )(query, key, value, wq, bq, wk, bk, wv, bv)


# ----------------------------------------------------------------------------
# Kernel 3: scaled dot-product attention (scores, scale, mask-fill, softmax, @v)
# ----------------------------------------------------------------------------
def _sdpa_kernel(q_ref, k_ref, v_ref, mask_ref, ctx_ref, attn_ref, *, scale):
    q = q_ref[0]                                        # (Lq, dph)
    k = k_ref[0]                                        # (Lk, dph)
    v = v_ref[0]                                        # (Lk, dph)
    scores = jax.lax.dot_general(
        q, k, (((1,), (1,)), ((), ())), preferred_element_type=jnp.float32) * scale
    scores = jnp.where(mask_ref[0] != 0, jnp.float32(-1e9), scores)
    m = jnp.max(scores, axis=-1, keepdims=True)
    p = jnp.exp(scores - m)
    attn = p / jnp.sum(p, axis=-1, keepdims=True)
    ctx_ref[0] = jnp.dot(attn, v, preferred_element_type=jnp.float32).astype(ctx_ref.dtype)
    attn_ref[0] = attn.astype(attn_ref.dtype)


# ----------------------------------------------------------------------------
# Kernel 4: linear_final + residual add + LayerNorm (fused)
# ----------------------------------------------------------------------------
def _proj_addnorm_kernel(ctx_ref, res_ref, w_ref, b_ref, g_ref, beta_ref, out_ref, *, eps):
    y = jnp.dot(ctx_ref[0], w_ref[...], preferred_element_type=jnp.float32) + b_ref[...]
    x = y + res_ref[0]
    out_ref[0] = _layer_norm(x, g_ref[...], beta_ref[...], eps).astype(out_ref.dtype)


# ----------------------------------------------------------------------------
# Kernel 5: position-wise FFN: w1 -> gelu -> w2 -> residual -> LayerNorm (fused)
# ----------------------------------------------------------------------------
def _ffn_kernel(x_ref, w1_ref, b1_ref, w2_ref, b2_ref, g_ref, beta_ref, out_ref, *, eps):
    x = x_ref[0]                                        # (L, D)
    h = jnp.dot(x, w1_ref[...], preferred_element_type=jnp.float32) + b1_ref[...]
    h = _gelu(h)
    y = jnp.dot(h, w2_ref[...], preferred_element_type=jnp.float32) + b2_ref[...]
    out_ref[0] = _layer_norm(x + y, g_ref[...], beta_ref[...], eps).astype(out_ref.dtype)


# ----------------------------------------------------------------------------
# Python wrappers reproducing the module structure
# ----------------------------------------------------------------------------
def multi_head_attention(p, key, value, query, attn_mask, num_heads):
    """MultiHeadAttention.forward (dropout p=0 -> identity)."""
    residual = query
    B, Lq, D = query.shape
    Lk = key.shape[1]
    dph = D // num_heads

    q_p, k_p, v_p = qkv_projection(query, key, value,
                                   p["wq"], p["bq"], p["wk"], p["bk"], p["wv"], p["bv"])

    # torch .view(B*H, -1, dph) == row-major reshape (reproduced exactly, interleaving included)
    q_bh = q_p.reshape(B * num_heads, -1, dph)
    k_bh = k_p.reshape(B * num_heads, -1, dph)
    v_bh = v_p.reshape(B * num_heads, -1, dph)
    Lq_bh, Lk_bh = q_bh.shape[1], k_bh.shape[1]

    if attn_mask is None:
        mask_bh = jnp.zeros((B * num_heads, Lq_bh, Lk_bh), jnp.int32)
    else:
        mask_bh = jnp.tile(attn_mask.astype(jnp.int32), (num_heads, 1, 1))

    # Faithful to the PyTorch source: scale = (key.size(-1) // num_heads) ** (-0.5)
    scale = float((dph // num_heads) ** (-0.5))

    ctx, attn = pl.pallas_call(
        functools.partial(_sdpa_kernel, scale=scale),
        out_shape=(
            jax.ShapeDtypeStruct((B * num_heads, Lq_bh, dph), jnp.float32),
            jax.ShapeDtypeStruct((B * num_heads, Lq_bh, Lk_bh), jnp.float32),
        ),
        grid=(B * num_heads,),
        in_specs=[
            pl.BlockSpec((1, Lq_bh, dph), lambda i: (i, 0, 0)),
            pl.BlockSpec((1, Lk_bh, dph), lambda i: (i, 0, 0)),
            pl.BlockSpec((1, Lk_bh, dph), lambda i: (i, 0, 0)),
            pl.BlockSpec((1, Lq_bh, Lk_bh), lambda i: (i, 0, 0)),
        ],
        out_specs=(
            pl.BlockSpec((1, Lq_bh, dph), lambda i: (i, 0, 0)),
            pl.BlockSpec((1, Lq_bh, Lk_bh), lambda i: (i, 0, 0)),
        ),
        compiler_params=pltpu.CompilerParams(dimension_semantics=("parallel",)),
    )(q_bh, k_bh, v_bh, mask_bh)

    context = ctx.reshape(B, -1, dph * num_heads)       # torch .view(B, -1, D)

    out = pl.pallas_call(
        functools.partial(_proj_addnorm_kernel, eps=1e-5),
        out_shape=jax.ShapeDtypeStruct((B, Lq, D), jnp.float32),
        grid=(B,),
        in_specs=[
            pl.BlockSpec((1, Lq, D), lambda b: (b, 0, 0)),
            pl.BlockSpec((1, Lq, D), lambda b: (b, 0, 0)),
            pl.BlockSpec((D, D), lambda b: (0, 0)),
            pl.BlockSpec((1, D), lambda b: (0, 0)),
            pl.BlockSpec((1, D), lambda b: (0, 0)),
            pl.BlockSpec((1, D), lambda b: (0, 0)),
        ],
        out_specs=pl.BlockSpec((1, Lq, D), lambda b: (b, 0, 0)),
        compiler_params=pltpu.CompilerParams(dimension_semantics=("parallel",)),
    )(context, residual, p["wf"], p["bf"], p["ln_g"], p["ln_b"])
    return out, attn


def feed_forward(p, x):
    B, L, D = x.shape
    F = p["w1"].shape[1]
    return pl.pallas_call(
        functools.partial(_ffn_kernel, eps=1e-5),
        out_shape=jax.ShapeDtypeStruct((B, L, D), jnp.float32),
        grid=(B,),
        in_specs=[
            pl.BlockSpec((1, L, D), lambda b: (b, 0, 0)),
            pl.BlockSpec((D, F), lambda b: (0, 0)),
            pl.BlockSpec((1, F), lambda b: (0, 0)),
            pl.BlockSpec((F, D), lambda b: (0, 0)),
            pl.BlockSpec((1, D), lambda b: (0, 0)),
            pl.BlockSpec((1, D), lambda b: (0, 0)),
            pl.BlockSpec((1, D), lambda b: (0, 0)),
        ],
        out_specs=pl.BlockSpec((1, L, D), lambda b: (b, 0, 0)),
        compiler_params=pltpu.CompilerParams(dimension_semantics=("parallel",)),
    )(x, p["w1"], p["b1"], p["w2"], p["b2"], p["ln_g"], p["ln_b"])


def decoder_forward(params, comments, memory, code_mask, comment_mask=None, *, num_heads):
    """Decoder.forward."""
    B, Lc = comments.shape
    x = embed_with_pe(comments, params["emb"], params["pe"][:Lc])
    comment_attn, code_attn = [], []
    for layer in params["layers"]:
        x, a1 = multi_head_attention(layer["self_attn"], x, x, x, comment_mask, num_heads)
        comment_attn.append(a1)
        x, a2 = multi_head_attention(layer["src_attn"], memory, memory, x, code_mask, num_heads)
        code_attn.append(a2)
        x = feed_forward(layer["ffn"], x)
    return x, comment_attn, code_attn


# ----------------------------------------------------------------------------
# parameter construction
# ----------------------------------------------------------------------------
def positional_encoding(max_len, d_model):
    position = jnp.arange(max_len, dtype=jnp.float32)[:, None]
    div_term = jnp.exp(jnp.arange(0, d_model, 2, dtype=jnp.float32) * (-(math.log(10000.0) / d_model)))
    pe = jnp.zeros((max_len, d_model), jnp.float32)
    pe = pe.at[:, 0::2].set(jnp.sin(position * div_term))
    pe = pe.at[:, 1::2].set(jnp.cos(position * div_term))
    return pe


def init_params(key, *, vocab_size, max_seq_len, num_layers, model_dim, num_heads, ffn_dim):
    k_emb, k_layers = jax.random.split(key)
    emb = 0.1 * jax.random.normal(k_emb, (vocab_size, model_dim), dtype=jnp.float32)
    emb = emb.at[0].set(0.0)                            # padding_idx=0
    pe = positional_encoding(max_seq_len, model_dim)

    def linear(k, din, dout):
        w = jax.random.normal(k, (din, dout), jnp.float32) / math.sqrt(din)
        return w, jnp.zeros((1, dout), jnp.float32)

    def mha_params(k):
        ks = jax.random.split(k, 4)
        wq, bq = linear(ks[0], model_dim, model_dim)
        wk, bk = linear(ks[1], model_dim, model_dim)
        wv, bv = linear(ks[2], model_dim, model_dim)
        wf, bf = linear(ks[3], model_dim, model_dim)
        return dict(wq=wq, bq=bq, wk=wk, bk=bk, wv=wv, bv=bv, wf=wf, bf=bf,
                    ln_g=jnp.ones((1, model_dim), jnp.float32),
                    ln_b=jnp.zeros((1, model_dim), jnp.float32))

    def ffn_params(k):
        ks = jax.random.split(k, 2)
        w1, b1 = linear(ks[0], model_dim, ffn_dim)
        w2, b2 = linear(ks[1], ffn_dim, model_dim)
        return dict(w1=w1, b1=b1, w2=w2, b2=b2,
                    ln_g=jnp.ones((1, model_dim), jnp.float32),
                    ln_b=jnp.zeros((1, model_dim), jnp.float32))

    layers = []
    for lk in jax.random.split(k_layers, num_layers):
        k1, k2, k3 = jax.random.split(lk, 3)
        layers.append(dict(self_attn=mha_params(k1), src_attn=mha_params(k2), ffn=ffn_params(k3)))
    return dict(emb=emb, pe=pe, layers=layers)


# ----------------------------------------------------------------------------
# pure-JAX reference (mirrors the PyTorch forward exactly) for self-check
# ----------------------------------------------------------------------------
def _mha_ref(p, key, value, query, attn_mask, num_heads):
    hp = jax.lax.Precision.HIGHEST
    residual = query
    B, Lq, D = query.shape
    dph = D // num_heads
    k = jnp.dot(key, p["wk"], precision=hp) + p["bk"]
    v = jnp.dot(value, p["wv"], precision=hp) + p["bv"]
    q = jnp.dot(query, p["wq"], precision=hp) + p["bq"]
    k = k.reshape(B * num_heads, -1, dph)
    v = v.reshape(B * num_heads, -1, dph)
    q = q.reshape(B * num_heads, -1, dph)
    scale = (dph // num_heads) ** (-0.5)
    scores = jnp.einsum("bqd,bkd->bqk", q, k, precision=hp) * scale
    if attn_mask is not None:
        mask = jnp.tile(attn_mask.astype(jnp.int32), (num_heads, 1, 1))
        scores = jnp.where(mask != 0, jnp.float32(-1e9), scores)
    attn = jax.nn.softmax(scores, axis=-1)
    ctx = jnp.einsum("bqk,bkd->bqd", attn, v, precision=hp)
    ctx = ctx.reshape(B, -1, D)
    out = jnp.dot(ctx, p["wf"], precision=hp) + p["bf"]
    out = _layer_norm(out + residual, p["ln_g"], p["ln_b"])
    return out, attn


def _ffn_ref(p, x):
    hp = jax.lax.Precision.HIGHEST
    h = _gelu(jnp.dot(x, p["w1"], precision=hp) + p["b1"])
    y = jnp.dot(h, p["w2"], precision=hp) + p["b2"]
    return _layer_norm(x + y, p["ln_g"], p["ln_b"])


def decoder_ref(params, comments, memory, code_mask, comment_mask, *, num_heads):
    B, Lc = comments.shape
    x = params["emb"][comments] + params["pe"][:Lc][None]
    c_attn, k_attn = [], []
    for layer in params["layers"]:
        x, a1 = _mha_ref(layer["self_attn"], x, x, x, comment_mask, num_heads)
        c_attn.append(a1)
        x, a2 = _mha_ref(layer["src_attn"], memory, memory, x, code_mask, num_heads)
        k_attn.append(a2)
        x = _ffn_ref(layer["ffn"], x)
    return x, c_attn, k_attn


# ----------------------------------------------------------------------------
# main
# ----------------------------------------------------------------------------
if __name__ == "__main__":
    vocab_size = 50
    max_seq_len = 32
    num_layers = 2
    model_dim = 32
    num_heads = 2          # dim_per_head = 16, dim_per_head // num_heads = 8 > 0
    ffn_dim = 64
    B, Lc, Lm = 2, 8, 12

    root = jax.random.PRNGKey(0)
    k_par, k_ids, k_mem = jax.random.split(root, 3)

    params = init_params(k_par, vocab_size=vocab_size, max_seq_len=max_seq_len,
                         num_layers=num_layers, model_dim=model_dim,
                         num_heads=num_heads, ffn_dim=ffn_dim)

    comments = jax.random.randint(k_ids, (B, Lc), 0, vocab_size, dtype=jnp.int32)
    memory = jax.random.normal(k_mem, (B, Lm, model_dim), dtype=jnp.float32)

    # causal mask for self-attention (1 = masked), padding mask for cross-attention
    comment_mask = jnp.broadcast_to(jnp.triu(jnp.ones((Lc, Lc), jnp.int32), k=1), (B, Lc, Lc))
    pad = jnp.zeros((B, Lm), jnp.int32).at[1, Lm - 3:].set(1)
    code_mask = jnp.broadcast_to(pad[:, None, :], (B, Lc, Lm))

    fwd = jax.jit(functools.partial(decoder_forward, num_heads=num_heads))
    out, comment_attn, code_attn = fwd(params, comments, memory, code_mask, comment_mask)
    jax.block_until_ready((out, comment_attn, code_attn))

    # correctness check against a pure-JAX reference
    ref_out, ref_cattn, ref_kattn = decoder_ref(params, comments, memory, code_mask,
                                                comment_mask, num_heads=num_heads)

    assert out.shape == (B, Lc, model_dim)
    assert len(comment_attn) == num_layers and comment_attn[0].shape == (B * num_heads, Lc, Lc)
    assert len(code_attn) == num_layers and code_attn[0].shape == (B * num_heads, Lc, Lm)
    assert bool(jnp.all(jnp.isfinite(out)))
    assert jnp.allclose(out, ref_out, atol=5e-3, rtol=5e-3), "decoder output mismatch"
    assert jnp.allclose(comment_attn[-1], ref_cattn[-1], atol=5e-3, rtol=5e-3), "self-attn mismatch"
    assert jnp.allclose(code_attn[-1], ref_kattn[-1], atol=5e-3, rtol=5e-3), "src-attn mismatch"

    print("KERNEL_OK")
</pallas_src>

<mosaic_0001>
module attributes {stable_mosaic.version = 11 : i64} {
  func.func @_embed_pe_kernel(%arg0: i32, %arg1: memref<1x8x1xi32, #tpu.memory_space<vmem>>, %arg2: memref<50x32xf32, #tpu.memory_space<vmem>>, %arg3: memref<8x32xf32, #tpu.memory_space<vmem>>, %arg4: memref<1x8x32xf32, #tpu.memory_space<vmem>>) attributes {dimension_semantics = [#tpu.dimension_semantics<parallel>], iteration_bounds = array<i64: 2>, scalar_prefetch = 0 : i64, scratch_operands = 0 : i64, tpu.core_type = #tpu.core_type<tc>, window_params = [{transform_indices = @transform_0, window_bounds = array<i64: 1, 8, 1>}, {pipeline_mode = #tpu.pipeline_mode<synchronous>, transform_indices = @transform_1, window_bounds = array<i64: 50, 32>}, {pipeline_mode = #tpu.pipeline_mode<synchronous>, transform_indices = @transform_2, window_bounds = array<i64: 8, 32>}, {transform_indices = @transform_3, window_bounds = array<i64: 1, 8, 32>}]} {
    %c0 = arith.constant 0 : index
    %c0_0 = arith.constant 0 : index
    %c0_1 = arith.constant 0 : index
    %0 = vector.load %arg1[%c0, %c0_0, %c0_1] : memref<1x8x1xi32, #tpu.memory_space<vmem>>, vector<1x8x1xi32>
    %1 = vector.shape_cast %0 : vector<1x8x1xi32> to vector<8x1xi32>
    %c0_2 = arith.constant 0 : index
    %c0_3 = arith.constant 0 : index
    %2 = vector.load %arg2[%c0_2, %c0_3] : memref<50x32xf32, #tpu.memory_space<vmem>>, vector<50x32xf32>
    %3 = tpu.iota {dimensions = array<i32: 1>} : vector<8x50xi32>
    %4 = vector.broadcast %1 : vector<8x1xi32> to vector<8x50xi32>
    %5 = arith.cmpi eq, %4, %3 : vector<8x50xi32>
    %6 = arith.extui %5 : vector<8x50xi1> to vector<8x50xi32>
    %7 = arith.sitofp %6 : vector<8x50xi32> to vector<8x50xf32>
    %cst = arith.constant dense<0.000000e+00> : vector<8x32xf32>
    %8 = tpu.matmul %7, %2, %cst {dimension_numbers = #tpu.dot_dimension_numbers<[1], [0], [0], [1], [0, 0, 1, 1], [], []>} : vector<8x50xf32>, vector<50x32xf32>, vector<8x32xf32> -> vector<8x32xf32>
    %c0_4 = arith.constant 0 : index
    %c0_5 = arith.constant 0 : index
    %9 = vector.load %arg3[%c0_4, %c0_5] : memref<8x32xf32, #tpu.memory_space<vmem>>, vector<8x32xf32>
    %10 = arith.addf %8, %9 : vector<8x32xf32>
    %c0_6 = arith.constant 0 : index
    %c0_7 = arith.constant 0 : index
    %c0_8 = arith.constant 0 : index
    %11 = vector.load %arg4[%c0_6, %c0_7, %c0_8] : memref<1x8x32xf32, #tpu.memory_space<vmem>>, vector<1x8x32xf32>
    %12 = vector.shape_cast %11 : vector<1x8x32xf32> to vector<8x32xf32>
    %13 = vector.shape_cast %10 : vector<8x32xf32> to vector<1x8x32xf32>
    tpu.vector_store %arg4[%c0_6, %c0_7, %c0_8], %13 {strides = array<i32>} : memref<1x8x32xf32, #tpu.memory_space<vmem>>, vector<1x8x32xf32>,
    return
  }
  func.func @transform_0(%arg0: i32) -> (i32, i32, i32) {
    %c0_i32 = arith.constant 0 : i32
    %c0_i32_0 = arith.constant 0 : i32
    %c0_i32_1 = arith.constant 0 : i32
    return %arg0, %c0_i32, %c0_i32_0 : i32, i32, i32
  }
  func.func @transform_1(%arg0: i32) -> (i32, i32) {
    %c0_i32 = arith.constant 0 : i32
    %c0_i32_0 = arith.constant 0 : i32
    %c0_i32_1 = arith.constant 0 : i32
    return %c0_i32, %c0_i32_0 : i32, i32
  }
  func.func @transform_2(%arg0: i32) -> (i32, i32) {
    %c0_i32 = arith.constant 0 : i32
    %c0_i32_0 = arith.constant 0 : i32
    %c0_i32_1 = arith.constant 0 : i32
    return %c0_i32, %c0_i32_0 : i32, i32
  }
  func.func @transform_3(%arg0: i32) -> (i32, i32, i32) {
    %c0_i32 = arith.constant 0 : i32
    %c0_i32_0 = arith.constant 0 : i32
    %c0_i32_1 = arith.constant 0 : i32
    return %arg0, %c0_i32, %c0_i32_0 : i32, i32, i32
  }
}

module attributes {stable_mosaic.version = 11 : i64} {
  func.func @_qkv_proj_kernel(%arg0: i32, %arg1: memref<1x8x32xf32, #tpu.memory_space<vmem>>, %arg2: memref<1x8x32xf32, #tpu.memory_space<vmem>>, %arg3: memref<1x8x32xf32, #tpu.memory_space<vmem>>, %arg4: memref<32x32xf32, #tpu.memory_space<vmem>>, %arg5: memref<1x32xf32, #tpu.memory_space<vmem>>, %arg6: memref<32x32xf32, #tpu.memory_space<vmem>>, %arg7: memref<1x32xf32, #tpu.memory_space<vmem>>, %arg8: memref<32x32xf32, #tpu.memory_space<vmem>>, %arg9: memref<1x32xf32, #tpu.memory_space<vmem>>, %arg10: memref<1x8x32xf32, #tpu.memory_space<vmem>>, %arg11: memref<1x8x32xf32, #tpu.memory_space<vmem>>, %arg12: memref<1x8x32xf32, #tpu.memory_space<vmem>>) attributes {dimension_semantics = [#tpu.dimension_semantics<parallel>], iteration_bounds = array<i64: 2>, scalar_prefetch = 0 : i64, scratch_operands = 0 : i64, tpu.core_type = #tpu.core_type<tc>, window_params = [{transform_indices = @transform_0, window_bounds = array<i64: 1, 8, 32>}, {transform_indices = @transform_1, window_bounds = array<i64: 1, 8, 32>}, {transform_indices = @transform_2, window_bounds = array<i64: 1, 8, 32>}, {pipeline_mode = #tpu.pipeline_mode<synchronous>, transform_indices = @transform_3, window_bounds = array<i64: 32, 32>}, {pipeline_mode = #tpu.pipeline_mode<synchronous>, transform_indices = @transform_4, window_bounds = array<i64: 1, 32>}, {pipeline_mode = #tpu.pipeline_mode<synchronous>, transform_indices = @transform_5, window_bounds = array<i64: 32, 32>}, {pipeline_mode = #tpu.pipeline_mode<synchronous>, transform_indices = @transform_6, window_bounds = array<i64: 1, 32>}, {pipeline_mode = #tpu.pipeline_mode<synchronous>, transform_indices = @transform_7, window_bounds = array<i64: 32, 32>}, {pipeline_mode = #tpu.pipeline_mode<synchronous>, transform_indices = @transform_8, window_bounds = array<i64: 1, 32>}, {transform_indices = @transform_9, window_bounds = array<i64: 1, 8, 32>}, {transform_indices = @transform_10, window_bounds = array<i64: 1, 8, 32>}, {transform_indices = @transform_11, window_bounds = array<i64: 1, 8, 32>}]} {
    %c0 = arith.constant 0 : index
    %c0_0 = arith.constant 0 : index
    %c0_1 = arith.constant 0 : index
    %0 = vector.load %arg1[%c0, %c0_0, %c0_1] : memref<1x8x32xf32, #tpu.memory_space<vmem>>, vector<1x8x32xf32>
    %1 = vector.shape_cast %0 : vector<1x8x32xf32> to vector<8x32xf32>
    %c0_2 = arith.constant 0 : index
    %c0_3 = arith.constant 0 : index
    %2 = vector.load %arg4[%c0_2, %c0_3] : memref<32x32xf32, #tpu.memory_space<vmem>>, vector<32x32xf32>
    %cst = arith.constant dense<0.000000e+00> : vector<8x32xf32>
    %3 = tpu.matmul %1, %2, %cst {dimension_numbers = #tpu.dot_dimension_numbers<[1], [0], [0], [1], [0, 0, 1, 1], [], []>} : vector<8x32xf32>, vector<32x32xf32>, vector<8x32xf32> -> vector<8x32xf32>
    %c0_4 = arith.constant 0 : index
    %c0_5 = arith.constant 0 : index
    %4 = vector.load %arg5[%c0_4, %c0_5] : memref<1x32xf32, #tpu.memory_space<vmem>>, vector<1x32xf32>
    %5 = vector.broadcast %4 : vector<1x32xf32> to vector<8x32xf32>
    %6 = arith.addf %3, %5 : vector<8x32xf32>
    %c0_6 = arith.constant 0 : index
    %c0_7 = arith.constant 0 : index
    %c0_8 = arith.constant 0 : index
    %7 = vector.load %arg10[%c0_6, %c0_7, %c0_8] : memref<1x8x32xf32, #tpu.memory_space<vmem>>, vector<1x8x32xf32>
    %8 = vector.shape_cast %7 : vector<1x8x32xf32> to vector<8x32xf32>
    %9 = vector.shape_cast %6 : vector<8x32xf32> to vector<1x8x32xf32>
    tpu.vector_store %arg10[%c0_6, %c0_7, %c0_8], %9 {strides = array<i32>} : memref<1x8x32xf32, #tpu.memory_space<vmem>>, vector<1x8x32xf32>,
    %c0_9 = arith.constant 0 : index
    %c0_10 = arith.constant 0 : index
    %c0_11 = arith.constant 0 : index
    %10 = vector.load %arg2[%c0_9, %c0_10, %c0_11] : memref<1x8x32xf32, #tpu.memory_space<vmem>>, vector<1x8x32xf32>
    %11 = vector.shape_cast %10 : vector<1x8x32xf32> to vector<8x32xf32>
    %c0_12 = arith.constant 0 : index
    %c0_13 = arith.constant 0 : index
    %12 = vector.load %arg6[%c0_12, %c0_13] : memref<32x32xf32, #tpu.memory_space<vmem>>, vector<32x32xf32>
    %cst_14 = arith.constant dense<0.000000e+00> : vector<8x32xf32>
    %13 = tpu.matmul %11, %12, %cst_14 {dimension_numbers = #tpu.dot_dimension_numbers<[1], [0], [0], [1], [0, 0, 1, 1], [], []>} : vector<8x32xf32>, vector<32x32xf32>, vector<8x32xf32> -> vector<8x32xf32>
    %c0_15 = arith.constant 0 : index
    %c0_16 = arith.constant 0 : index
    %14 = vector.load %arg7[%c0_15, %c0_16] : memref<1x32xf32, #tpu.memory_space<vmem>>, vector<1x32xf32>
    %15 = vector.broadcast %14 : vector<1x32xf32> to vector<8x32xf32>
    %16 = arith.addf %13, %15 : vector<8x32xf32>
    %c0_17 = arith.constant 0 : index
    %c0_18 = arith.constant 0 : index
    %c0_19 = arith.constant 0 : index
    %17 = vector.load %arg11[%c0_17, %c0_18, %c0_19] : memref<1x8x32xf32, #tpu.memory_space<vmem>>, vector<1x8x32xf32>
    %18 = vector.shape_cast %17 : vector<1x8x32xf32> to vector<8x32xf32>
    %19 = vector.shape_cast %16 : vector<8x32xf32> to vector<1x8x32xf32>
    tpu.vector_store %arg11[%c0_17, %c0_18, %c0_19], %19 {strides = array<i32>} : memref<1x8x32xf32, #tpu.memory_space<vmem>>, vector<1x8x32xf32>,
    %c0_20 = arith.constant 0 : index
    %c0_21 = arith.constant 0 : index
    %c0_22 = arith.constant 0 : index
    %20 = vector.load %arg3[%c0_20, %c0_21, %c0_22] : memref<1x8x32xf32, #tpu.memory_space<vmem>>, vector<1x8x32xf32>
    %21 = vector.shape_cast %20 : vector<1x8x32xf32> to vector<8x32xf32>
    %c0_23 = arith.constant 0 : index
    %c0_24 = arith.constant 0 : index
    %22 = vector.load %arg8[%c0_23, %c0_24] : memref<32x32xf32, #tpu.memory_space<vmem>>, vector<32x32xf32>
    %cst_25 = arith.constant dense<0.000000e+00> : vector<8x32xf32>
    %23 = tpu.matmul %21, %22, %cst_25 {dimension_numbers = #tpu.dot_dimension_numbers<[1], [0], [0], [1], [0, 0, 1, 1], [], []>} : vector<8x32xf32>, vector<32x32xf32>, vector<8x32xf32> -> vector<8x32xf32>
    %c0_26 = arith.constant 0 : index
    %c0_27 = arith.constant 0 : index
    %24 = vector.load %arg9[%c0_26, %c0_27] : memref<1x32xf32, #tpu.memory_space<vmem>>, vector<1x32xf32>
    %25 = vector.broadcast %24 : vector<1x32xf32> to vector<8x32xf32>
    %26 = arith.addf %23, %25 : vector<8x32xf32>
    %c0_28 = arith.constant 0 : index
    %c0_29 = arith.constant 0 : index
    %c0_30 = arith.constant 0 : index
    %27 = vector.load %arg12[%c0_28, %c0_29, %c0_30] : memref<1x8x32xf32, #tpu.memory_space<vmem>>, vector<1x8x32xf32>
    %28 = vector.shape_cast %27 : vector<1x8x32xf32> to vector<8x32xf32>
    %29 = vector.shape_cast %26 : vector<8x32xf32> to vector<1x8x32xf32>
    tpu.vector_store %arg12[%c0_28, %c0_29, %c0_30], %29 {strides = array<i32>} : memref<1x8x32xf32, #tpu.memory_space<vmem>>, vector<1x8x32xf32>,
    return
  }
  func.func @transform_0(%arg0: i32) -> (i32, i32, i32) {
    %c0_i32 = arith.constant 0 : i32
    %c0_i32_0 = arith.constant 0 : i32
    %c0_i32_1 = arith.constant 0 : i32
    return %arg0, %c0_i32, %c0_i32_0 : i32, i32, i32
  }
  func.func @transform_1(%arg0: i32) -> (i32, i32, i32) {
    %c0_i32 = arith.constant 0 : i32
    %c0_i32_0 = arith.constant 0 : i32
    %c0_i32_1 = arith.constant 0 : i32
    return %arg0, %c0_i32, %c0_i32_0 : i32, i32, i32
  }
  func.func @transform_2(%arg0: i32) -> (i32, i32, i32) {
    %c0_i32 = arith.constant 0 : i32
    %c0_i32_0 = arith.constant 0 : i32
    %c0_i32_1 = arith.constant 0 : i32
    return %arg0, %c0_i32, %c0_i32_0 : i32, i32, i32
  }
  func.func @transform_3(%arg0: i32) -> (i32, i32) {
    %c0_i32 = arith.constant 0 : i32
    %c0_i32_0 = arith.constant 0 : i32
    %c0_i32_1 = arith.constant 0 : i32
    return %c0_i32, %c0_i32_0 : i32, i32
  }
  func.func @transform_4(%arg0: i32) -> (i32, i32) {
    %c0_i32 = arith.constant 0 : i32
    %c0_i32_0 = arith.constant 0 : i32
    %c0_i32_1 = arith.constant 0 : i32
    return %c0_i32, %c0_i32_0 : i32, i32
  }
  func.func @transform_5(%arg0: i32) -> (i32, i32) {
    %c0_i32 = arith.constant 0 : i32
    %c0_i32_0 = arith.constant 0 : i32
    %c0_i32_1 = arith.constant 0 : i32
    return %c0_i32, %c0_i32_0 : i32, i32
  }
  func.func @transform_6(%arg0: i32) -> (i32, i32) {
    %c0_i32 = arith.constant 0 : i32
    %c0_i32_0 = arith.constant 0 : i32
    %c0_i32_1 = arith.constant 0 : i32
    return %c0_i32, %c0_i32_0 : i32, i32
  }
  func.func @transform_7(%arg0: i32) -> (i32, i32) {
    %c0_i32 = arith.constant 0 : i32
    %c0_i32_0 = arith.constant 0 : i32
    %c0_i32_1 = arith.constant 0 : i32
    return %c0_i32, %c0_i32_0 : i32, i32
  }
  func.func @transform_8(%arg0: i32) -> (i32, i32) {
    %c0_i32 = arith.constant 0 : i32
    %c0_i32_0 = arith.constant 0 : i32
    %c0_i32_1 = arith.constant 0 : i32
    return %c0_i32, %c0_i32_0 : i32, i32
  }
  func.func @transform_9(%arg0: i32) -> (i32, i32, i32) {
    %c0_i32 = arith.constant 0 : i32
    %c0_i32_0 = arith.constant 0 : i32
    %c0_i32_1 = arith.constant 0 : i32
    return %arg0, %c0_i32, %c0_i32_0 : i32, i32, i32
  }
  func.func @transform_10(%arg0: i32) -> (i32, i32, i32) {
    %c0_i32 = arith.constant 0 : i32
    %c0_i32_0 = arith.constant 0 : i32
    %c0_i32_1 = arith.constant 0 : i32
    return %arg0, %c0_i32, %c0_i32_0 : i32, i32, i32
  }
  func.func @transform_11(%arg0: i32) -> (i32, i32, i32) {
    %c0_i32 = arith.constant 0 : i32
    %c0_i32_0 = arith.constant 0 : i32
    %c0_i32_1 = arith.constant 0 : i32
    return %arg0, %c0_i32, %c0_i32_0 : i32, i32, i32
  }
}

module attributes {stable_mosaic.version = 11 : i64} {
  func.func @_sdpa_kernel(%arg0: i32, %arg1: memref<1x8x16xf32, #tpu.memory_space<vmem>>, %arg2: memref<1x8x16xf32, #tpu.memory_space<vmem>>, %arg3: memref<1x8x16xf32, #tpu.memory_space<vmem>>, %arg4: memref<1x8x8xi32, #tpu.memory_space<vmem>>, %arg5: memref<1x8x16xf32, #tpu.memory_space<vmem>>, %arg6: memref<1x8x8xf32, #tpu.memory_space<vmem>>) attributes {dimension_semantics = [#tpu.dimension_semantics<parallel>], iteration_bounds = array<i64: 4>, scalar_prefetch = 0 : i64, scratch_operands = 0 : i64, tpu.core_type = #tpu.core_type<tc>, window_params = [{transform_indices = @transform_0, window_bounds = array<i64: 1, 8, 16>}, {transform_indices = @transform_1, window_bounds = array<i64: 1, 8, 16>}, {transform_indices = @transform_2, window_bounds = array<i64: 1, 8, 16>}, {transform_indices = @transform_3, window_bounds = array<i64: 1, 8, 8>}, {transform_indices = @transform_4, window_bounds = array<i64: 1, 8, 16>}, {transform_indices = @transform_5, window_bounds = array<i64: 1, 8, 8>}]} {
    %c0 = arith.constant 0 : index
    %c0_0 = arith.constant 0 : index
    %c0_1 = arith.constant 0 : index
    %0 = vector.load %arg1[%c0, %c0_0, %c0_1] : memref<1x8x16xf32, #tpu.memory_space<vmem>>, vector<1x8x16xf32>
    %1 = vector.shape_cast %0 : vector<1x8x16xf32> to vector<8x16xf32>
    %c0_2 = arith.constant 0 : index
    %c0_3 = arith.constant 0 : index
    %c0_4 = arith.constant 0 : index
    %2 = vector.load %arg2[%c0_2, %c0_3, %c0_4] : memref<1x8x16xf32, #tpu.memory_space<vmem>>, vector<1x8x16xf32>
    %3 = vector.shape_cast %2 : vector<1x8x16xf32> to vector<8x16xf32>
    %c0_5 = arith.constant 0 : index
    %c0_6 = arith.constant 0 : index
    %c0_7 = arith.constant 0 : index
    %4 = vector.load %arg3[%c0_5, %c0_6, %c0_7] : memref<1x8x16xf32, #tpu.memory_space<vmem>>, vector<1x8x16xf32>
    %5 = vector.shape_cast %4 : vector<1x8x16xf32> to vector<8x16xf32>
    %cst = arith.constant dense<0.000000e+00> : vector<8x8xf32>
    %6 = tpu.matmul %1, %3, %cst {dimension_numbers = #tpu.dot_dimension_numbers<[1], [1], [0], [0], [0, 0, 1, 0], [], []>} : vector<8x16xf32>, vector<8x16xf32>, vector<8x8xf32> -> vector<8x8xf32>
    %cst_8 = arith.constant 0.353553385 : f32
    %7 = vector.broadcast %cst_8 : f32 to vector<8x8xf32>
    %8 = arith.mulf %6, %7 : vector<8x8xf32>
    %c0_9 = arith.constant 0 : index
    %c0_10 = arith.constant 0 : index
    %c0_11 = arith.constant 0 : index
    %9 = vector.load %arg4[%c0_9, %c0_10, %c0_11] : memref<1x8x8xi32, #tpu.memory_space<vmem>>, vector<1x8x8xi32>
    %10 = vector.shape_cast %9 : vector<1x8x8xi32> to vector<8x8xi32>
    %c0_i32 = arith.constant 0 : i32
    %11 = vector.broadcast %c0_i32 : i32 to vector<8x8xi32>
    %12 = arith.cmpi ne, %10, %11 : vector<8x8xi32>
    %cst_12 = arith.constant -1.000000e+09 : f32
    %13 = vector.broadcast %cst_12 : f32 to vector<8x8xf32>
    %14 = arith.select %12, %13, %8 : vector<8x8xi1>, vector<8x8xf32>
    %cst_13 = arith.constant dense<0xFF800000> : vector<8xf32>
    %15 = vector.multi_reduction <maximumf>, %14, %cst_13 [1] : vector<8x8xf32> to vector<8xf32>
    %16 = vector.shape_cast %15 : vector<8xf32> to vector<8x1xf32>
    %17 = vector.broadcast %16 : vector<8x1xf32> to vector<8x8xf32>
    %18 = arith.subf %14, %17 : vector<8x8xf32>
    %19 = math.exp %18 : vector<8x8xf32>
    %cst_14 = arith.constant dense<0.000000e+00> : vector<8xf32>
    %20 = vector.multi_reduction <add>, %19, %cst_14 [1] : vector<8x8xf32> to vector<8xf32>
    %21 = vector.shape_cast %20 : vector<8xf32> to vector<8x1xf32>
    %22 = vector.broadcast %21 : vector<8x1xf32> to vector<8x8xf32>
    %23 = arith.divf %19, %22 : vector<8x8xf32>
    %cst_15 = arith.constant dense<0.000000e+00> : vector<8x16xf32>
    %24 = tpu.matmul %23, %5, %cst_15 {dimension_numbers = #tpu.dot_dimension_numbers<[1], [0], [0], [1], [0, 0, 1, 1], [], []>} : vector<8x8xf32>, vector<8x16xf32>, vector<8x16xf32> -> vector<8x16xf32>
    %c0_16 = arith.constant 0 : index
    %c0_17 = arith.constant 0 : index
    %c0_18 = arith.constant 0 : index
    %25 = vector.load %arg5[%c0_16, %c0_17, %c0_18] : memref<1x8x16xf32, #tpu.memory_space<vmem>>, vector<1x8x16xf32>
    %26 = vector.shape_cast %25 : vector<1x8x16xf32> to vector<8x16xf32>
    %27 = vector.shape_cast %24 : vector<8x16xf32> to vector<1x8x16xf32>
    tpu.vector_store %arg5[%c0_16, %c0_17, %c0_18], %27 {strides = array<i32>} : memref<1x8x16xf32, #tpu.memory_space<vmem>>, vector<1x8x16xf32>,
    %c0_19 = arith.constant 0 : index
    %c0_20 = arith.constant 0 : index
    %c0_21 = arith.constant 0 : index
    %28 = vector.load %arg6[%c0_19, %c0_20, %c0_21] : memref<1x8x8xf32, #tpu.memory_space<vmem>>, vector<1x8x8xf32>
    %29 = vector.shape_cast %28 : vector<1x8x8xf32> to vector<8x8xf32>
    %30 = vector.shape_cast %23 : vector<8x8xf32> to vector<1x8x8xf32>
    tpu.vector_store %arg6[%c0_19, %c0_20, %c0_21], %30 {strides = array<i32>} : memref<1x8x8xf32, #tpu.memory_space<vmem>>, vector<1x8x8xf32>,
    return
  }
  func.func @transform_0(%arg0: i32) -> (i32, i32, i32) {
    %c0_i32 = arith.constant 0 : i32
    %c0_i32_0 = arith.constant 0 : i32
    %c0_i32_1 = arith.constant 0 : i32
    return %arg0, %c0_i32, %c0_i32_0 : i32, i32, i32
  }
  func.func @transform_1(%arg0: i32) -> (i32, i32, i32) {
    %c0_i32 = arith.constant 0 : i32
    %c0_i32_0 = arith.constant 0 : i32
    %c0_i32_1 = arith.constant 0 : i32
    return %arg0, %c0_i32, %c0_i32_0 : i32, i32, i32
  }
  func.func @transform_2(%arg0: i32) -> (i32, i32, i32) {
    %c0_i32 = arith.constant 0 : i32
    %c0_i32_0 = arith.constant 0 : i32
    %c0_i32_1 = arith.constant 0 : i32
    return %arg0, %c0_i32, %c0_i32_0 : i32, i32, i32
  }
  func.func @transform_3(%arg0: i32) -> (i32, i32, i32) {
    %c0_i32 = arith.constant 0 : i32
    %c0_i32_0 = arith.constant 0 : i32
    %c0_i32_1 = arith.constant 0 : i32
    return %arg0, %c0_i32, %c0_i32_0 : i32, i32, i32
  }
  func.func @transform_4(%arg0: i32) -> (i32, i32, i32) {
    %c0_i32 = arith.constant 0 : i32
    %c0_i32_0 = arith.constant 0 : i32
    %c0_i32_1 = arith.constant 0 : i32
    return %arg0, %c0_i32, %c0_i32_0 : i32, i32, i32
  }
  func.func @transform_5(%arg0: i32) -> (i32, i32, i32) {
    %c0_i32 = arith.constant 0 : i32
    %c0_i32_0 = arith.constant 0 : i32
    %c0_i32_1 = arith.constant 0 : i32
    return %arg0, %c0_i32, %c0_i32_0 : i32, i32, i32
  }
}

module attributes {stable_mosaic.version = 11 : i64} {
  func.func @_proj_addnorm_kernel(%arg0: i32, %arg1: memref<1x8x32xf32, #tpu.memory_space<vmem>>, %arg2: memref<1x8x32xf32, #tpu.memory_space<vmem>>, %arg3: memref<32x32xf32, #tpu.memory_space<vmem>>, %arg4: memref<1x32xf32, #tpu.memory_space<vmem>>, %arg5: memref<1x32xf32, #tpu.memory_space<vmem>>, %arg6: memref<1x32xf32, #tpu.memory_space<vmem>>, %arg7: memref<1x8x32xf32, #tpu.memory_space<vmem>>) attributes {dimension_semantics = [#tpu.dimension_semantics<parallel>], iteration_bounds = array<i64: 2>, scalar_prefetch = 0 : i64, scratch_operands = 0 : i64, tpu.core_type = #tpu.core_type<tc>, window_params = [{transform_indices = @transform_0, window_bounds = array<i64: 1, 8, 32>}, {transform_indices = @transform_1, window_bounds = array<i64: 1, 8, 32>}, {pipeline_mode = #tpu.pipeline_mode<synchronous>, transform_indices = @transform_2, window_bounds = array<i64: 32, 32>}, {pipeline_mode = #tpu.pipeline_mode<synchronous>, transform_indices = @transform_3, window_bounds = array<i64: 1, 32>}, {pipeline_mode = #tpu.pipeline_mode<synchronous>, transform_indices = @transform_4, window_bounds = array<i64: 1, 32>}, {pipeline_mode = #tpu.pipeline_mode<synchronous>, transform_indices = @transform_5, window_bounds = array<i64: 1, 32>}, {transform_indices = @transform_6, window_bounds = array<i64: 1, 8, 32>}]} {
    %c0 = arith.constant 0 : index
    %c0_0 = arith.constant 0 : index
    %c0_1 = arith.constant 0 : index
    %0 = vector.load %arg1[%c0, %c0_0, %c0_1] : memref<1x8x32xf32, #tpu.memory_space<vmem>>, vector<1x8x32xf32>
    %1 = vector.shape_cast %0 : vector<1x8x32xf32> to vector<8x32xf32>
    %c0_2 = arith.constant 0 : index
    %c0_3 = arith.constant 0 : index
    %2 = vector.load %arg3[%c0_2, %c0_3] : memref<32x32xf32, #tpu.memory_space<vmem>>, vector<32x32xf32>
    %cst = arith.constant dense<0.000000e+00> : vector<8x32xf32>
    %3 = tpu.matmul %1, %2, %cst {dimension_numbers = #tpu.dot_dimension_numbers<[1], [0], [0], [1], [0, 0, 1, 1], [], []>} : vector<8x32xf32>, vector<32x32xf32>, vector<8x32xf32> -> vector<8x32xf32>
    %c0_4 = arith.constant 0 : index
    %c0_5 = arith.constant 0 : index
    %4 = vector.load %arg4[%c0_4, %c0_5] : memref<1x32xf32, #tpu.memory_space<vmem>>, vector<1x32xf32>
    %5 = vector.broadcast %4 : vector<1x32xf32> to vector<8x32xf32>
    %6 = arith.addf %3, %5 : vector<8x32xf32>
    %c0_6 = arith.constant 0 : index
    %c0_7 = arith.constant 0 : index
    %c0_8 = arith.constant 0 : index
    %7 = vector.load %arg2[%c0_6, %c0_7, %c0_8] : memref<1x8x32xf32, #tpu.memory_space<vmem>>, vector<1x8x32xf32>
    %8 = vector.shape_cast %7 : vector<1x8x32xf32> to vector<8x32xf32>
    %9 = arith.addf %6, %8 : vector<8x32xf32>
    %c0_9 = arith.constant 0 : index
    %c0_10 = arith.constant 0 : index
    %10 = vector.load %arg5[%c0_9, %c0_10] : memref<1x32xf32, #tpu.memory_space<vmem>>, vector<1x32xf32>
    %c0_11 = arith.constant 0 : index
    %c0_12 = arith.constant 0 : index
    %11 = vector.load %arg6[%c0_11, %c0_12] : memref<1x32xf32, #tpu.memory_space<vmem>>, vector<1x32xf32>
    %cst_13 = arith.constant dense<0.000000e+00> : vector<8xf32>
    %12 = vector.multi_reduction <add>, %9, %cst_13 [1] : vector<8x32xf32> to vector<8xf32>
    %13 = vector.shape_cast %12 : vector<8xf32> to vector<8x1xf32>
    %cst_14 = arith.constant 3.200000e+01 : f32
    %14 = vector.broadcast %cst_14 : f32 to vector<8x1xf32>
    %15 = arith.divf %13, %14 : vector<8x1xf32>
    %16 = vector.broadcast %15 : vector<8x1xf32> to vector<8x32xf32>
    %17 = arith.subf %9, %16 : vector<8x32xf32>
    %18 = arith.mulf %17, %17 : vector<8x32xf32>
    %cst_15 = arith.constant dense<0.000000e+00> : vector<8xf32>
    %19 = vector.multi_reduction <add>, %18, %cst_15 [1] : vector<8x32xf32> to vector<8xf32>
    %20 = vector.shape_cast %19 : vector<8xf32> to vector<8x1xf32>
    %cst_16 = arith.constant 3.200000e+01 : f32
    %21 = vector.broadcast %cst_16 : f32 to vector<8x1xf32>
    %22 = arith.divf %20, %21 : vector<8x1xf32>
    %cst_17 = arith.constant 9.99999974E-6 : f32
    %23 = vector.broadcast %cst_17 : f32 to vector<8x1xf32>
    %24 = arith.addf %22, %23 : vector<8x1xf32>
    %25 = math.rsqrt %24 : vector<8x1xf32>
    %26 = vector.broadcast %25 : vector<8x1xf32> to vector<8x32xf32>
    %27 = arith.mulf %17, %26 : vector<8x32xf32>
    %28 = vector.broadcast %10 : vector<1x32xf32> to vector<8x32xf32>
    %29 = arith.mulf %27, %28 : vector<8x32xf32>
    %30 = vector.broadcast %11 : vector<1x32xf32> to vector<8x32xf32>
    %31 = arith.addf %29, %30 : vector<8x32xf32>
    %c0_18 = arith.constant 0 : index
    %c0_19 = arith.constant 0 : index
    %c0_20 = arith.constant 0 : index
    %32 = vector.load %arg7[%c0_18, %c0_19, %c0_20] : memref<1x8x32xf32, #tpu.memory_space<vmem>>, vector<1x8x32xf32>
    %33 = vector.shape_cast %32 : vector<1x8x32xf32> to vector<8x32xf32>
    %34 = vector.shape_cast %31 : vector<8x32xf32> to vector<1x8x32xf32>
    tpu.vector_store %arg7[%c0_18, %c0_19, %c0_20], %34 {strides = array<i32>} : memref<1x8x32xf32, #tpu.memory_space<vmem>>, vector<1x8x32xf32>,
    return
  }
  func.func @transform_0(%arg0: i32) -> (i32, i32, i32) {
    %c0_i32 = arith.constant 0 : i32
    %c0_i32_0 = arith.constant 0 : i32
    %c0_i32_1 = arith.constant 0 : i32
    return %arg0, %c0_i32, %c0_i32_0 : i32, i32, i32
  }
  func.func @transform_1(%arg0: i32) -> (i32, i32, i32) {
    %c0_i32 = arith.constant 0 : i32
    %c0_i32_0 = arith.constant 0 : i32
    %c0_i32_1 = arith.constant 0 : i32
    return %arg0, %c0_i32, %c0_i32_0 : i32, i32, i32
  }
  func.func @transform_2(%arg0: i32) -> (i32, i32) {
    %c0_i32 = arith.constant 0 : i32
    %c0_i32_0 = arith.constant 0 : i32
    %c0_i32_1 = arith.constant 0 : i32
    return %c0_i32, %c0_i32_0 : i32, i32
  }
  func.func @transform_3(%arg0: i32) -> (i32, i32) {
    %c0_i32 = arith.constant 0 : i32
    %c0_i32_0 = arith.constant 0 : i32
    %c0_i32_1 = arith.constant 0 : i32
    return %c0_i32, %c0_i32_0 : i32, i32
  }
  func.func @transform_4(%arg0: i32) -> (i32, i32) {
    %c0_i32 = arith.constant 0 : i32
    %c0_i32_0 = arith.constant 0 : i32
    %c0_i32_1 = arith.constant 0 : i32
    return %c0_i32, %c0_i32_0 : i32, i32
  }
  func.func @transform_5(%arg0: i32) -> (i32, i32) {
    %c0_i32 = arith.constant 0 : i32
    %c0_i32_0 = arith.constant 0 : i32
    %c0_i32_1 = arith.constant 0 : i32
    return %c0_i32, %c0_i32_0 : i32, i32
  }
  func.func @transform_6(%arg0: i32) -> (i32, i32, i32) {
    %c0_i32 = arith.constant 0 : i32
    %c0_i32_0 = arith.constant 0 : i32
    %c0_i32_1 = arith.constant 0 : i32
    return %arg0, %c0_i32, %c0_i32_0 : i32, i32, i32
  }
}

module attributes {stable_mosaic.version = 11 : i64} {
  func.func @_qkv_proj_kernel(%arg0: i32, %arg1: memref<1x8x32xf32, #tpu.memory_space<vmem>>, %arg2: memref<1x12x32xf32, #tpu.memory_space<vmem>>, %arg3: memref<1x12x32xf32, #tpu.memory_space<vmem>>, %arg4: memref<32x32xf32, #tpu.memory_space<vmem>>, %arg5: memref<1x32xf32, #tpu.memory_space<vmem>>, %arg6: memref<32x32xf32, #tpu.memory_space<vmem>>, %arg7: memref<1x32xf32, #tpu.memory_space<vmem>>, %arg8: memref<32x32xf32, #tpu.memory_space<vmem>>, %arg9: memref<1x32xf32, #tpu.memory_space<vmem>>, %arg10: memref<1x8x32xf32, #tpu.memory_space<vmem>>, %arg11: memref<1x12x32xf32, #tpu.memory_space<vmem>>, %arg12: memref<1x12x32xf32, #tpu.memory_space<vmem>>) attributes {dimension_semantics = [#tpu.dimension_semantics<parallel>], iteration_bounds = array<i64: 2>, scalar_prefetch = 0 : i64, scratch_operands = 0 : i64, tpu.core_type = #tpu.core_type<tc>, window_params = [{transform_indices = @transform_0, window_bounds = array<i64: 1, 8, 32>}, {transform_indices = @transform_1, window_bounds = array<i64: 1, 12, 32>}, {transform_indices = @transform_2, window_bounds = array<i64: 1, 12, 32>}, {pipeline_mode = #tpu.pipeline_mode<synchronous>, transform_indices = @transform_3, window_bounds = array<i64: 32, 32>}, {pipeline_mode = #tpu.pipeline_mode<synchronous>, transform_indices = @transform_4, window_bounds = array<i64: 1, 32>}, {pipeline_mode = #tpu.pipeline_mode<synchronous>, transform_indices = @transform_5, window_bounds = array<i64: 32, 32>}, {pipeline_mode = #tpu.pipeline_mode<synchronous>, transform_indices = @transform_6, window_bounds = array<i64: 1, 32>}, {pipeline_mode = #tpu.pipeline_mode<synchronous>, transform_indices = @transform_7, window_bounds = array<i64: 32, 32>}, {pipeline_mode = #tpu.pipeline_mode<synchronous>, transform_indices = @transform_8, window_bounds = array<i64: 1, 32>}, {transform_indices = @transform_9, window_bounds = array<i64: 1, 8, 32>}, {transform_indices = @transform_10, window_bounds = array<i64: 1, 12, 32>}, {transform_indices = @transform_11, window_bounds = array<i64: 1, 12, 32>}]} {
    %c0 = arith.constant 0 : index
    %c0_0 = arith.constant 0 : index
    %c0_1 = arith.constant 0 : index
    %0 = vector.load %arg1[%c0, %c0_0, %c0_1] : memref<1x8x32xf32, #tpu.memory_space<vmem>>, vector<1x8x32xf32>
    %1 = vector.shape_cast %0 : vector<1x8x32xf32> to vector<8x32xf32>
    %c0_2 = arith.constant 0 : index
    %c0_3 = arith.constant 0 : index
    %2 = vector.load %arg4[%c0_2, %c0_3] : memref<32x32xf32, #tpu.memory_space<vmem>>, vector<32x32xf32>
    %cst = arith.constant dense<0.000000e+00> : vector<8x32xf32>
    %3 = tpu.matmul %1, %2, %cst {dimension_numbers = #tpu.dot_dimension_numbers<[1], [0], [0], [1], [0, 0, 1, 1], [], []>} : vector<8x32xf32>, vector<32x32xf32>, vector<8x32xf32> -> vector<8x32xf32>
    %c0_4 = arith.constant 0 : index
    %c0_5 = arith.constant 0 : index
    %4 = vector.load %arg5[%c0_4, %c0_5] : memref<1x32xf32, #tpu.memory_space<vmem>>, vector<1x32xf32>
    %5 = vector.broadcast %4 : vector<1x32xf32> to vector<8x32xf32>
    %6 = arith.addf %3, %5 : vector<8x32xf32>
    %c0_6 = arith.constant 0 : index
    %c0_7 = arith.constant 0 : index
    %c0_8 = arith.constant 0 : index
    %7 = vector.load %arg10[%c0_6, %c0_7, %c0_8] : memref<1x8x32xf32, #tpu.memory_space<vmem>>, vector<1x8x32xf32>
    %8 = vector.shape_cast %7 : vector<1x8x32xf32> to vector<8x32xf32>
    %9 = vector.shape_cast %6 : vector<8x32xf32> to vector<1x8x32xf32>
    tpu.vector_store %arg10[%c0_6, %c0_7, %c0_8], %9 {strides = array<i32>} : memref<1x8x32xf32, #tpu.memory_space<vmem>>, vector<1x8x32xf32>,
    %c0_9 = arith.constant 0 : index
    %c0_10 = arith.constant 0 : index
    %c0_11 = arith.constant 0 : index
    %10 = vector.load %arg2[%c0_9, %c0_10, %c0_11] : memref<1x12x32xf32, #tpu.memory_space<vmem>>, vector<1x12x32xf32>
    %11 = vector.shape_cast %10 : vector<1x12x32xf32> to vector<12x32xf32>
    %c0_12 = arith.constant 0 : index
    %c0_13 = arith.constant 0 : index
    %12 = vector.load %arg6[%c0_12, %c0_13] : memref<32x32xf32, #tpu.memory_space<vmem>>, vector<32x32xf32>
    %cst_14 = arith.constant dense<0.000000e+00> : vector<12x32xf32>
    %13 = tpu.matmul %11, %12, %cst_14 {dimension_numbers = #tpu.dot_dimension_numbers<[1], [0], [0], [1], [0, 0, 1, 1], [], []>} : vector<12x32xf32>, vector<32x32xf32>, vector<12x32xf32> -> vector<12x32xf32>
    %c0_15 = arith.constant 0 : index
    %c0_16 = arith.constant 0 : index
    %14 = vector.load %arg7[%c0_15, %c0_16] : memref<1x32xf32, #tpu.memory_space<vmem>>, vector<1x32xf32>
    %15 = vector.broadcast %14 : vector<1x32xf32> to vector<12x32xf32>
    %16 = arith.addf %13, %15 : vector<12x32xf32>
    %c0_17 = arith.constant 0 : index
    %c0_18 = arith.constant 0 : index
    %c0_19 = arith.constant 0 : index
    %17 = vector.load %arg11[%c0_17, %c0_18, %c0_19] : memref<1x12x32xf32, #tpu.memory_space<vmem>>, vector<1x12x32xf32>
    %18 = vector.shape_cast %17 : vector<1x12x32xf32> to vector<12x32xf32>
    %19 = vector.shape_cast %16 : vector<12x32xf32> to vector<1x12x32xf32>
    tpu.vector_store %arg11[%c0_17, %c0_18, %c0_19], %19 {strides = array<i32>} : memref<1x12x32xf32, #tpu.memory_space<vmem>>, vector<1x12x32xf32>,
    %c0_20 = arith.constant 0 : index
    %c0_21 = arith.constant 0 : index
    %c0_22 = arith.constant 0 : index
    %20 = vector.load %arg3[%c0_20, %c0_21, %c0_22] : memref<1x12x32xf32, #tpu.memory_space<vmem>>, vector<1x12x32xf32>
    %21 = vector.shape_cast %20 : vector<1x12x32xf32> to vector<12x32xf32>
    %c0_23 = arith.constant 0 : index
    %c0_24 = arith.constant 0 : index
    %22 = vector.load %arg8[%c0_23, %c0_24] : memref<32x32xf32, #tpu.memory_space<vmem>>, vector<32x32xf32>
    %cst_25 = arith.constant dense<0.000000e+00> : vector<12x32xf32>
    %23 = tpu.matmul %21, %22, %cst_25 {dimension_numbers = #tpu.dot_dimension_numbers<[1], [0], [0], [1], [0, 0, 1, 1], [], []>} : vector<12x32xf32>, vector<32x32xf32>, vector<12x32xf32> -> vector<12x32xf32>
    %c0_26 = arith.constant 0 : index
    %c0_27 = arith.constant 0 : index
    %24 = vector.load %arg9[%c0_26, %c0_27] : memref<1x32xf32, #tpu.memory_space<vmem>>, vector<1x32xf32>
    %25 = vector.broadcast %24 : vector<1x32xf32> to vector<12x32xf32>
    %26 = arith.addf %23, %25 : vector<12x32xf32>
    %c0_28 = arith.constant 0 : index
    %c0_29 = arith.constant 0 : index
    %c0_30 = arith.constant 0 : index
    %27 = vector.load %arg12[%c0_28, %c0_29, %c0_30] : memref<1x12x32xf32, #tpu.memory_space<vmem>>, vector<1x12x32xf32>
    %28 = vector.shape_cast %27 : vector<1x12x32xf32> to vector<12x32xf32>
    %29 = vector.shape_cast %26 : vector<12x32xf32> to vector<1x12x32xf32>
    tpu.vector_store %arg12[%c0_28, %c0_29, %c0_30], %29 {strides = array<i32>} : memref<1x12x32xf32, #tpu.memory_space<vmem>>, vector<1x12x32xf32>,
    return
  }
  func.func @transform_0(%arg0: i32) -> (i32, i32, i32) {
    %c0_i32 = arith.constant 0 : i32
    %c0_i32_0 = arith.constant 0 : i32
    %c0_i32_1 = arith.constant 0 : i32
    return %arg0, %c0_i32, %c0_i32_0 : i32, i32, i32
  }
  func.func @transform_1(%arg0: i32) -> (i32, i32, i32) {
    %c0_i32 = arith.constant 0 : i32
    %c0_i32_0 = arith.constant 0 : i32
    %c0_i32_1 = arith.constant 0 : i32
    return %arg0, %c0_i32, %c0_i32_0 : i32, i32, i32
  }
  func.func @transform_2(%arg0: i32) -> (i32, i32, i32) {
    %c0_i32 = arith.constant 0 : i32
    %c0_i32_0 = arith.constant 0 : i32
    %c0_i32_1 = arith.constant 0 : i32
    return %arg0, %c0_i32, %c0_i32_0 : i32, i32, i32
  }
  func.func @transform_3(%arg0: i32) -> (i32, i32) {
    %c0_i32 = arith.constant 0 : i32
    %c0_i32_0 = arith.constant 0 : i32
    %c0_i32_1 = arith.constant 0 : i32
    return %c0_i32, %c0_i32_0 : i32, i32
  }
  func.func @transform_4(%arg0: i32) -> (i32, i32) {
    %c0_i32 = arith.constant 0 : i32
    %c0_i32_0 = arith.constant 0 : i32
    %c0_i32_1 = arith.constant 0 : i32
    return %c0_i32, %c0_i32_0 : i32, i32
  }
  func.func @transform_5(%arg0: i32) -> (i32, i32) {
    %c0_i32 = arith.constant 0 : i32
    %c0_i32_0 = arith.constant 0 : i32
    %c0_i32_1 = arith.constant 0 : i32
    return %c0_i32, %c0_i32_0 : i32, i32
  }
  func.func @transform_6(%arg0: i32) -> (i32, i32) {
    %c0_i32 = arith.constant 0 : i32
    %c0_i32_0 = arith.constant 0 : i32
    %c0_i32_1 = arith.constant 0 : i32
    return %c0_i32, %c0_i32_0 : i32, i32
  }
  func.func @transform_7(%arg0: i32) -> (i32, i32) {
    %c0_i32 = arith.constant 0 : i32
    %c0_i32_0 = arith.constant 0 : i32
    %c0_i32_1 = arith.constant 0 : i32
    return %c0_i32, %c0_i32_0 : i32, i32
  }
  func.func @transform_8(%arg0: i32) -> (i32, i32) {
    %c0_i32 = arith.constant 0 : i32
    %c0_i32_0 = arith.constant 0 : i32
    %c0_i32_1 = arith.constant 0 : i32
    return %c0_i32, %c0_i32_0 : i32, i32
  }
  func.func @transform_9(%arg0: i32) -> (i32, i32, i32) {
    %c0_i32 = arith.constant 0 : i32
    %c0_i32_0 = arith.constant 0 : i32
    %c0_i32_1 = arith.constant 0 : i32
    return %arg0, %c0_i32, %c0_i32_0 : i32, i32, i32
  }
  func.func @transform_10(%arg0: i32) -> (i32, i32, i32) {
    %c0_i32 = arith.constant 0 : i32
    %c0_i32_0 = arith.constant 0 : i32
    %c0_i32_1 = arith.constant 0 : i32
    return %arg0, %c0_i32, %c0_i32_0 : i32, i32, i32
  }
  func.func @transform_11(%arg0: i32) -> (i32, i32, i32) {
    %c0_i32 = arith.constant 0 : i32
    %c0_i32_0 = arith.constant 0 : i32
    %c0_i32_1 = arith.constant 0 : i32
    return %arg0, %c0_i32, %c0_i32_0 : i32, i32, i32
  }
}

module attributes {stable_mosaic.version = 11 : i64} {
  func.func @_ffn_kernel(%arg0: i32, %arg1: memref<1x8x32xf32, #tpu.memory_space<vmem>>, %arg2: memref<32x64xf32, #tpu.memory_space<vmem>>, %arg3: memref<1x64xf32, #tpu.memory_space<vmem>>, %arg4: memref<64x32xf32, #tpu.memory_space<vmem>>, %arg5: memref<1x32xf32, #tpu.memory_space<vmem>>, %arg6: memref<1x32xf32, #tpu.memory_space<vmem>>, %arg7: memref<1x32xf32, #tpu.memory_space<vmem>>, %arg8: memref<1x8x32xf32, #tpu.memory_space<vmem>>) attributes {dimension_semantics = [#tpu.dimension_semantics<parallel>], iteration_bounds = array<i64: 2>, scalar_prefetch = 0 : i64, scratch_operands = 0 : i64, tpu.core_type = #tpu.core_type<tc>, window_params = [{transform_indices = @transform_0, window_bounds = array<i64: 1, 8, 32>}, {pipeline_mode = #tpu.pipeline_mode<synchronous>, transform_indices = @transform_1, window_bounds = array<i64: 32, 64>}, {pipeline_mode = #tpu.pipeline_mode<synchronous>, transform_indices = @transform_2, window_bounds = array<i64: 1, 64>}, {pipeline_mode = #tpu.pipeline_mode<synchronous>, transform_indices = @transform_3, window_bounds = array<i64: 64, 32>}, {pipeline_mode = #tpu.pipeline_mode<synchronous>, transform_indices = @transform_4, window_bounds = array<i64: 1, 32>}, {pipeline_mode = #tpu.pipeline_mode<synchronous>, transform_indices = @transform_5, window_bounds = array<i64: 1, 32>}, {pipeline_mode = #tpu.pipeline_mode<synchronous>, transform_indices = @transform_6, window_bounds = array<i64: 1, 32>}, {transform_indices = @transform_7, window_bounds = array<i64: 1, 8, 32>}]} {
    %c0 = arith.constant 0 : index
    %c0_0 = arith.constant 0 : index
    %c0_1 = arith.constant 0 : index
    %0 = vector.load %arg1[%c0, %c0_0, %c0_1] : memref<1x8x32xf32, #tpu.memory_space<vmem>>, vector<1x8x32xf32>
    %1 = vector.shape_cast %0 : vector<1x8x32xf32> to vector<8x32xf32>
    %c0_2 = arith.constant 0 : index
    %c0_3 = arith.constant 0 : index
    %2 = vector.load %arg2[%c0_2, %c0_3] : memref<32x64xf32, #tpu.memory_space<vmem>>, vector<32x64xf32>
    %cst = arith.constant dense<0.000000e+00> : vector<8x64xf32>
    %3 = tpu.matmul %1, %2, %cst {dimension_numbers = #tpu.dot_dimension_numbers<[1], [0], [0], [1], [0, 0, 1, 1], [], []>} : vector<8x32xf32>, vector<32x64xf32>, vector<8x64xf32> -> vector<8x64xf32>
    %c0_4 = arith.constant 0 : index
    %c0_5 = arith.constant 0 : index
    %4 = vector.load %arg3[%c0_4, %c0_5] : memref<1x64xf32, #tpu.memory_space<vmem>>, vector<1x64xf32>
    %5 = vector.broadcast %4 : vector<1x64xf32> to vector<8x64xf32>
    %6 = arith.addf %3, %5 : vector<8x64xf32>
    %cst_6 = arith.constant 5.000000e-01 : f32
    %7 = vector.broadcast %cst_6 : f32 to vector<8x64xf32>
    %8 = arith.mulf %7, %6 : vector<8x64xf32>
    %cst_7 = arith.constant 4.471500e-02 : f32
    %9 = vector.broadcast %cst_7 : f32 to vector<8x64xf32>
    %10 = arith.mulf %9, %6 : vector<8x64xf32>
    %11 = arith.mulf %10, %6 : vector<8x64xf32>
    %12 = arith.mulf %11, %6 : vector<8x64xf32>
    %13 = arith.addf %6, %12 : vector<8x64xf32>
    %cst_8 = arith.constant 0.797884583 : f32
    %14 = vector.broadcast %cst_8 : f32 to vector<8x64xf32>
    %15 = arith.mulf %14, %13 : vector<8x64xf32>
    %16 = math.tanh %15 : vector<8x64xf32>
    %cst_9 = arith.constant 1.000000e+00 : f32
    %17 = vector.broadcast %cst_9 : f32 to vector<8x64xf32>
    %18 = arith.addf %17, %16 : vector<8x64xf32>
    %19 = arith.mulf %8, %18 : vector<8x64xf32>
    %c0_10 = arith.constant 0 : index
    %c0_11 = arith.constant 0 : index
    %20 = vector.load %arg4[%c0_10, %c0_11] : memref<64x32xf32, #tpu.memory_space<vmem>>, vector<64x32xf32>
    %cst_12 = arith.constant dense<0.000000e+00> : vector<8x32xf32>
    %21 = tpu.matmul %19, %20, %cst_12 {dimension_numbers = #tpu.dot_dimension_numbers<[1], [0], [0], [1], [0, 0, 1, 1], [], []>} : vector<8x64xf32>, vector<64x32xf32>, vector<8x32xf32> -> vector<8x32xf32>
    %c0_13 = arith.constant 0 : index
    %c0_14 = arith.constant 0 : index
    %22 = vector.load %arg5[%c0_13, %c0_14] : memref<1x32xf32, #tpu.memory_space<vmem>>, vector<1x32xf32>
    %23 = vector.broadcast %22 : vector<1x32xf32> to vector<8x32xf32>
    %24 = arith.addf %21, %23 : vector<8x32xf32>
    %25 = arith.addf %1, %24 : vector<8x32xf32>
    %c0_15 = arith.constant 0 : index
    %c0_16 = arith.constant 0 : index
    %26 = vector.load %arg6[%c0_15, %c0_16] : memref<1x32xf32, #tpu.memory_space<vmem>>, vector<1x32xf32>
    %c0_17 = arith.constant 0 : index
    %c0_18 = arith.constant 0 : index
    %27 = vector.load %arg7[%c0_17, %c0_18] : memref<1x32xf32, #tpu.memory_space<vmem>>, vector<1x32xf32>
    %cst_19 = arith.constant dense<0.000000e+00> : vector<8xf32>
    %28 = vector.multi_reduction <add>, %25, %cst_19 [1] : vector<8x32xf32> to vector<8xf32>
    %29 = vector.shape_cast %28 : vector<8xf32> to vector<8x1xf32>
    %cst_20 = arith.constant 3.200000e+01 : f32
    %30 = vector.broadcast %cst_20 : f32 to vector<8x1xf32>
    %31 = arith.divf %29, %30 : vector<8x1xf32>
    %32 = vector.broadcast %31 : vector<8x1xf32> to vector<8x32xf32>
    %33 = arith.subf %25, %32 : vector<8x32xf32>
    %34 = arith.mulf %33, %33 : vector<8x32xf32>
    %cst_21 = arith.constant dense<0.000000e+00> : vector<8xf32>
    %35 = vector.multi_reduction <add>, %34, %cst_21 [1] : vector<8x32xf32> to vector<8xf32>
    %36 = vector.shape_cast %35 : vector<8xf32> to vector<8x1xf32>
    %cst_22 = arith.constant 3.200000e+01 : f32
    %37 = vector.broadcast %cst_22 : f32 to vector<8x1xf32>
    %38 = arith.divf %36, %37 : vector<8x1xf32>
    %cst_23 = arith.constant 9.99999974E-6 : f32
    %39 = vector.broadcast %cst_23 : f32 to vector<8x1xf32>
    %40 = arith.addf %38, %39 : vector<8x1xf32>
    %41 = math.rsqrt %40 : vector<8x1xf32>
    %42 = vector.broadcast %41 : vector<8x1xf32> to vector<8x32xf32>
    %43 = arith.mulf %33, %42 : vector<8x32xf32>
    %44 = vector.broadcast %26 : vector<1x32xf32> to vector<8x32xf32>
    %45 = arith.mulf %43, %44 : vector<8x32xf32>
    %46 = vector.broadcast %27 : vector<1x32xf32> to vector<8x32xf32>
    %47 = arith.addf %45, %46 : vector<8x32xf32>
    %c0_24 = arith.constant 0 : index
    %c0_25 = arith.constant 0 : index
    %c0_26 = arith.constant 0 : index
    %48 = vector.load %arg8[%c0_24, %c0_25, %c0_26] : memref<1x8x32xf32, #tpu.memory_space<vmem>>, vector<1x8x32xf32>
    %49 = vector.shape_cast %48 : vector<1x8x32xf32> to vector<8x32xf32>
    %50 = vector.shape_cast %47 : vector<8x32xf32> to vector<1x8x32xf32>
    tpu.vector_store %arg8[%c0_24, %c0_25, %c0_26], %50 {strides = array<i32>} : memref<1x8x32xf32, #tpu.memory_space<vmem>>, vector<1x8x32xf32>,
    return
  }
  func.func @transform_0(%arg0: i32) -> (i32, i32, i32) {
    %c0_i32 = arith.constant 0 : i32
    %c0_i32_0 = arith.constant 0 : i32
    %c0_i32_1 = arith.constant 0 : i32
    return %arg0, %c0_i32, %c0_i32_0 : i32, i32, i32
  }
  func.func @transform_1(%arg0: i32) -> (i32, i32) {
    %c0_i32 = arith.constant 0 : i32
    %c0_i32_0 = arith.constant 0 : i32
    %c0_i32_1 = arith.constant 0 : i32
    return %c0_i32, %c0_i32_0 : i32, i32
  }
  func.func @transform_2(%arg0: i32) -> (i32, i32) {
    %c0_i32 = arith.constant 0 : i32
    %c0_i32_0 = arith.constant 0 : i32
    %c0_i32_1 = arith.constant 0 : i32
    return %c0_i32, %c0_i32_0 : i32, i32
  }
  func.func @transform_3(%arg0: i32) -> (i32, i32) {
    %c0_i32 = arith.constant 0 : i32
    %c0_i32_0 = arith.constant 0 : i32
    %c0_i32_1 = arith.constant 0 : i32
    return %c0_i32, %c0_i32_0 : i32, i32
  }
  func.func @transform_4(%arg0: i32) -> (i32, i32) {
    %c0_i32 = arith.constant 0 : i32
    %c0_i32_0 = arith.constant 0 : i32
    %c0_i32_1 = arith.constant 0 : i32
    return %c0_i32, %c0_i32_0 : i32, i32
  }
  func.func @transform_5(%arg0: i32) -> (i32, i32) {
    %c0_i32 = arith.constant 0 : i32
    %c0_i32_0 = arith.constant 0 : i32
    %c0_i32_1 = arith.constant 0 : i32
    return %c0_i32, %c0_i32_0 : i32, i32
  }
  func.func @transform_6(%arg0: i32) -> (i32, i32) {
    %c0_i32 = arith.constant 0 : i32
    %c0_i32_0 = arith.constant 0 : i32
    %c0_i32_1 = arith.constant 0 : i32
    return %c0_i32, %c0_i32_0 : i32, i32
  }
  func.func @transform_7(%arg0: i32) -> (i32, i32, i32) {
    %c0_i32 = arith.constant 0 : i32
    %c0_i32_0 = arith.constant 0 : i32
    %c0_i32_1 = arith.constant 0 : i32
    return %arg0, %c0_i32, %c0_i32_0 : i32, i32, i32
  }
}

module attributes {stable_mosaic.version = 11 : i64} {
  func.func @_sdpa_kernel(%arg0: i32, %arg1: memref<1x8x16xf32, #tpu.memory_space<vmem>>, %arg2: memref<1x12x16xf32, #tpu.memory_space<vmem>>, %arg3: memref<1x12x16xf32, #tpu.memory_space<vmem>>, %arg4: memref<1x8x12xi32, #tpu.memory_space<vmem>>, %arg5: memref<1x8x16xf32, #tpu.memory_space<vmem>>, %arg6: memref<1x8x12xf32, #tpu.memory_space<vmem>>) attributes {dimension_semantics = [#tpu.dimension_semantics<parallel>], iteration_bounds = array<i64: 4>, scalar_prefetch = 0 : i64, scratch_operands = 0 : i64, tpu.core_type = #tpu.core_type<tc>, window_params = [{transform_indices = @transform_0, window_bounds = array<i64: 1, 8, 16>}, {transform_indices = @transform_1, window_bounds = array<i64: 1, 12, 16>}, {transform_indices = @transform_2, window_bounds = array<i64: 1, 12, 16>}, {transform_indices = @transform_3, window_bounds = array<i64: 1, 8, 12>}, {transform_indices = @transform_4, window_bounds = array<i64: 1, 8, 16>}, {transform_indices = @transform_5, window_bounds = array<i64: 1, 8, 12>}]} {
    %c0 = arith.constant 0 : index
    %c0_0 = arith.constant 0 : index
    %c0_1 = arith.constant 0 : index
    %0 = vector.load %arg1[%c0, %c0_0, %c0_1] : memref<1x8x16xf32, #tpu.memory_space<vmem>>, vector<1x8x16xf32>
    %1 = vector.shape_cast %0 : vector<1x8x16xf32> to vector<8x16xf32>
    %c0_2 = arith.constant 0 : index
    %c0_3 = arith.constant 0 : index
    %c0_4 = arith.constant 0 : index
    %2 = vector.load %arg2[%c0_2, %c0_3, %c0_4] : memref<1x12x16xf32, #tpu.memory_space<vmem>>, vector<1x12x16xf32>
    %3 = vector.shape_cast %2 : vector<1x12x16xf32> to vector<12x16xf32>
    %c0_5 = arith.constant 0 : index
    %c0_6 = arith.constant 0 : index
    %c0_7 = arith.constant 0 : index
    %4 = vector.load %arg3[%c0_5, %c0_6, %c0_7] : memref<1x12x16xf32, #tpu.memory_space<vmem>>, vector<1x12x16xf32>
    %5 = vector.shape_cast %4 : vector<1x12x16xf32> to vector<12x16xf32>
    %cst = arith.constant dense<0.000000e+00> : vector<8x12xf32>
    %6 = tpu.matmul %1, %3, %cst {dimension_numbers = #tpu.dot_dimension_numbers<[1], [1], [0], [0], [0, 0, 1, 0], [], []>} : vector<8x16xf32>, vector<12x16xf32>, vector<8x12xf32> -> vector<8x12xf32>
    %cst_8 = arith.constant 0.353553385 : f32
    %7 = vector.broadcast %cst_8 : f32 to vector<8x12xf32>
    %8 = arith.mulf %6, %7 : vector<8x12xf32>
    %c0_9 = arith.constant 0 : index
    %c0_10 = arith.constant 0 : index
    %c0_11 = arith.constant 0 : index
    %9 = vector.load %arg4[%c0_9, %c0_10, %c0_11] : memref<1x8x12xi32, #tpu.memory_space<vmem>>, vector<1x8x12xi32>
    %10 = vector.shape_cast %9 : vector<1x8x12xi32> to vector<8x12xi32>
    %c0_i32 = arith.constant 0 : i32
    %11 = vector.broadcast %c0_i32 : i32 to vector<8x12xi32>
    %12 = arith.cmpi ne, %10, %11 : vector<8x12xi32>
    %cst_12 = arith.constant -1.000000e+09 : f32
    %13 = vector.broadcast %cst_12 : f32 to vector<8x12xf32>
    %14 = arith.select %12, %13, %8 : vector<8x12xi1>, vector<8x12xf32>
    %cst_13 = arith.constant dense<0xFF800000> : vector<8xf32>
    %15 = vector.multi_reduction <maximumf>, %14, %cst_13 [1] : vector<8x12xf32> to vector<8xf32>
    %16 = vector.shape_cast %15 : vector<8xf32> to vector<8x1xf32>
    %17 = vector.broadcast %16 : vector<8x1xf32> to vector<8x12xf32>
    %18 = arith.subf %14, %17 : vector<8x12xf32>
    %19 = math.exp %18 : vector<8x12xf32>
    %cst_14 = arith.constant dense<0.000000e+00> : vector<8xf32>
    %20 = vector.multi_reduction <add>, %19, %cst_14 [1] : vector<8x12xf32> to vector<8xf32>
    %21 = vector.shape_cast %20 : vector<8xf32> to vector<8x1xf32>
    %22 = vector.broadcast %21 : vector<8x1xf32> to vector<8x12xf32>
    %23 = arith.divf %19, %22 : vector<8x12xf32>
    %cst_15 = arith.constant dense<0.000000e+00> : vector<8x16xf32>
    %24 = tpu.matmul %23, %5, %cst_15 {dimension_numbers = #tpu.dot_dimension_numbers<[1], [0], [0], [1], [0, 0, 1, 1], [], []>} : vector<8x12xf32>, vector<12x16xf32>, vector<8x16xf32> -> vector<8x16xf32>
    %c0_16 = arith.constant 0 : index
    %c0_17 = arith.constant 0 : index
    %c0_18 = arith.constant 0 : index
    %25 = vector.load %arg5[%c0_16, %c0_17, %c0_18] : memref<1x8x16xf32, #tpu.memory_space<vmem>>, vector<1x8x16xf32>
    %26 = vector.shape_cast %25 : vector<1x8x16xf32> to vector<8x16xf32>
    %27 = vector.shape_cast %24 : vector<8x16xf32> to vector<1x8x16xf32>
    tpu.vector_store %arg5[%c0_16, %c0_17, %c0_18], %27 {strides = array<i32>} : memref<1x8x16xf32, #tpu.memory_space<vmem>>, vector<1x8x16xf32>,
    %c0_19 = arith.constant 0 : index
    %c0_20 = arith.constant 0 : index
    %c0_21 = arith.constant 0 : index
    %28 = vector.load %arg6[%c0_19, %c0_20, %c0_21] : memref<1x8x12xf32, #tpu.memory_space<vmem>>, vector<1x8x12xf32>
    %29 = vector.shape_cast %28 : vector<1x8x12xf32> to vector<8x12xf32>
    %30 = vector.shape_cast %23 : vector<8x12xf32> to vector<1x8x12xf32>
    tpu.vector_store %arg6[%c0_19, %c0_20, %c0_21], %30 {strides = array<i32>} : memref<1x8x12xf32, #tpu.memory_space<vmem>>, vector<1x8x12xf32>,
    return
  }
  func.func @transform_0(%arg0: i32) -> (i32, i32, i32) {
    %c0_i32 = arith.constant 0 : i32
    %c0_i32_0 = arith.constant 0 : i32
    %c0_i32_1 = arith.constant 0 : i32
    return %arg0, %c0_i32, %c0_i32_0 : i32, i32, i32
  }
  func.func @transform_1(%arg0: i32) -> (i32, i32, i32) {
    %c0_i32 = arith.constant 0 : i32
    %c0_i32_0 = arith.constant 0 : i32
    %c0_i32_1 = arith.constant 0 : i32
    return %arg0, %c0_i32, %c0_i32_0 : i32, i32, i32
  }
  func.func @transform_2(%arg0: i32) -> (i32, i32, i32) {
    %c0_i32 = arith.constant 0 : i32
    %c0_i32_0 = arith.constant 0 : i32
    %c0_i32_1 = arith.constant 0 : i32
    return %arg0, %c0_i32, %c0_i32_0 : i32, i32, i32
  }
  func.func @transform_3(%arg0: i32) -> (i32, i32, i32) {
    %c0_i32 = arith.constant 0 : i32
    %c0_i32_0 = arith.constant 0 : i32
    %c0_i32_1 = arith.constant 0 : i32
    return %arg0, %c0_i32, %c0_i32_0 : i32, i32, i32
  }
  func.func @transform_4(%arg0: i32) -> (i32, i32, i32) {
    %c0_i32 = arith.constant 0 : i32
    %c0_i32_0 = arith.constant 0 : i32
    %c0_i32_1 = arith.constant 0 : i32
    return %arg0, %c0_i32, %c0_i32_0 : i32, i32, i32
  }
  func.func @transform_5(%arg0: i32) -> (i32, i32, i32) {
    %c0_i32 = arith.constant 0 : i32
    %c0_i32_0 = arith.constant 0 : i32
    %c0_i32_1 = arith.constant 0 : i32
    return %arg0, %c0_i32, %c0_i32_0 : i32, i32, i32
  }
}

module attributes {stable_mosaic.version = 11 : i64} {
  func.func @_ffn_kernel(%arg0: i32, %arg1: memref<1x8x32xf32, #tpu.memory_space<vmem>>, %arg2: memref<32x64xf32, #tpu.memory_space<vmem>>, %arg3: memref<1x64xf32, #tpu.memory_space<vmem>>, %arg4: memref<64x32xf32, #tpu.memory_space<vmem>>, %arg5: memref<1x32xf32, #tpu.memory_space<vmem>>, %arg6: memref<1x32xf32, #tpu.memory_space<vmem>>, %arg7: memref<1x32xf32, #tpu.memory_space<vmem>>, %arg8: memref<1x8x32xf32, #tpu.memory_space<vmem>>) attributes {dimension_semantics = [#tpu.dimension_semantics<parallel>], iteration_bounds = array<i64: 2>, scalar_prefetch = 0 : i64, scratch_operands = 0 : i64, tpu.core_type = #tpu.core_type<tc>, window_params = [{transform_indices = @transform_0, window_bounds = array<i64: 1, 8, 32>}, {pipeline_mode = #tpu.pipeline_mode<synchronous>, transform_indices = @transform_1, window_bounds = array<i64: 32, 64>}, {pipeline_mode = #tpu.pipeline_mode<synchronous>, transform_indices = @transform_2, window_bounds = array<i64: 1, 64>}, {pipeline_mode = #tpu.pipeline_mode<synchronous>, transform_indices = @transform_3, window_bounds = array<i64: 64, 32>}, {pipeline_mode = #tpu.pipeline_mode<synchronous>, transform_indices = @transform_4, window_bounds = array<i64: 1, 32>}, {pipeline_mode = #tpu.pipeline_mode<synchronous>, transform_indices = @transform_5, window_bounds = array<i64: 1, 32>}, {pipeline_mode = #tpu.pipeline_mode<synchronous>, transform_indices = @transform_6, window_bounds = array<i64: 1, 32>}, {transform_indices = @transform_7, window_bounds = array<i64: 1, 8, 32>}]} {
    %c0 = arith.constant 0 : index
    %c0_0 = arith.constant 0 : index
    %c0_1 = arith.constant 0 : index
    %0 = vector.load %arg1[%c0, %c0_0, %c0_1] : memref<1x8x32xf32, #tpu.memory_space<vmem>>, vector<1x8x32xf32>
    %1 = vector.shape_cast %0 : vector<1x8x32xf32> to vector<8x32xf32>
    %c0_2 = arith.constant 0 : index
    %c0_3 = arith.constant 0 : index
    %2 = vector.load %arg2[%c0_2, %c0_3] : memref<32x64xf32, #tpu.memory_space<vmem>>, vector<32x64xf32>
    %cst = arith.constant dense<0.000000e+00> : vector<8x64xf32>
    %3 = tpu.matmul %1, %2, %cst {dimension_numbers = #tpu.dot_dimension_numbers<[1], [0], [0], [1], [0, 0, 1, 1], [], []>} : vector<8x32xf32>, vector<32x64xf32>, vector<8x64xf32> -> vector<8x64xf32>
    %c0_4 = arith.constant 0 : index
    %c0_5 = arith.constant 0 : index
    %4 = vector.load %arg3[%c0_4, %c0_5] : memref<1x64xf32, #tpu.memory_space<vmem>>, vector<1x64xf32>
    %5 = vector.broadcast %4 : vector<1x64xf32> to vector<8x64xf32>
    %6 = arith.addf %3, %5 : vector<8x64xf32>
    %cst_6 = arith.constant 5.000000e-01 : f32
    %7 = vector.broadcast %cst_6 : f32 to vector<8x64xf32>
    %8 = arith.mulf %7, %6 : vector<8x64xf32>
    %cst_7 = arith.constant 4.471500e-02 : f32
    %9 = vector.broadcast %cst_7 : f32 to vector<8x64xf32>
    %10 = arith.mulf %9, %6 : vector<8x64xf32>
    %11 = arith.mulf %10, %6 : vector<8x64xf32>
    %12 = arith.mulf %11, %6 : vector<8x64xf32>
    %13 = arith.addf %6, %12 : vector<8x64xf32>
    %cst_8 = arith.constant 0.797884583 : f32
    %14 = vector.broadcast %cst_8 : f32 to vector<8x64xf32>
    %15 = arith.mulf %14, %13 : vector<8x64xf32>
    %16 = math.tanh %15 : vector<8x64xf32>
    %cst_9 = arith.constant 1.000000e+00 : f32
    %17 = vector.broadcast %cst_9 : f32 to vector<8x64xf32>
    %18 = arith.addf %17, %16 : vector<8x64xf32>
    %19 = arith.mulf %8, %18 : vector<8x64xf32>
    %c0_10 = arith.constant 0 : index
    %c0_11 = arith.constant 0 : index
    %20 = vector.load %arg4[%c0_10, %c0_11] : memref<64x32xf32, #tpu.memory_space<vmem>>, vector<64x32xf32>
    %cst_12 = arith.constant dense<0.000000e+00> : vector<8x32xf32>
    %21 = tpu.matmul %19, %20, %cst_12 {dimension_numbers = #tpu.dot_dimension_numbers<[1], [0], [0], [1], [0, 0, 1, 1], [], []>} : vector<8x64xf32>, vector<64x32xf32>, vector<8x32xf32> -> vector<8x32xf32>
    %c0_13 = arith.constant 0 : index
    %c0_14 = arith.constant 0 : index
    %22 = vector.load %arg5[%c0_13, %c0_14] : memref<1x32xf32, #tpu.memory_space<vmem>>, vector<1x32xf32>
    %23 = vector.broadcast %22 : vector<1x32xf32> to vector<8x32xf32>
    %24 = arith.addf %21, %23 : vector<8x32xf32>
    %25 = arith.addf %1, %24 : vector<8x32xf32>
    %c0_15 = arith.constant 0 : index
    %c0_16 = arith.constant 0 : index
    %26 = vector.load %arg6[%c0_15, %c0_16] : memref<1x32xf32, #tpu.memory_space<vmem>>, vector<1x32xf32>
    %c0_17 = arith.constant 0 : index
    %c0_18 = arith.constant 0 : index
    %27 = vector.load %arg7[%c0_17, %c0_18] : memref<1x32xf32, #tpu.memory_space<vmem>>, vector<1x32xf32>
    %cst_19 = arith.constant dense<0.000000e+00> : vector<8xf32>
    %28 = vector.multi_reduction <add>, %25, %cst_19 [1] : vector<8x32xf32> to vector<8xf32>
    %29 = vector.shape_cast %28 : vector<8xf32> to vector<8x1xf32>
    %cst_20 = arith.constant 3.200000e+01 : f32
    %30 = vector.broadcast %cst_20 : f32 to vector<8x1xf32>
    %31 = arith.divf %29, %30 : vector<8x1xf32>
    %32 = vector.broadcast %31 : vector<8x1xf32> to vector<8x32xf32>
    %33 = arith.subf %25, %32 : vector<8x32xf32>
    %34 = arith.mulf %33, %33 : vector<8x32xf32>
    %cst_21 = arith.constant dense<0.000000e+00> : vector<8xf32>
    %35 = vector.multi_reduction <add>, %34, %cst_21 [1] : vector<8x32xf32> to vector<8xf32>
    %36 = vector.shape_cast %35 : vector<8xf32> to vector<8x1xf32>
    %cst_22 = arith.constant 3.200000e+01 : f32
    %37 = vector.broadcast %cst_22 : f32 to vector<8x1xf32>
    %38 = arith.divf %36, %37 : vector<8x1xf32>
    %cst_23 = arith.constant 9.99999974E-6 : f32
    %39 = vector.broadcast %cst_23 : f32 to vector<8x1xf32>
    %40 = arith.addf %38, %39 : vector<8x1xf32>
    %41 = math.rsqrt %40 : vector<8x1xf32>
    %42 = vector.broadcast %41 : vector<8x1xf32> to vector<8x32xf32>
    %43 = arith.mulf %33, %42 : vector<8x32xf32>
    %44 = vector.broadcast %26 : vector<1x32xf32> to vector<8x32xf32>
    %45 = arith.mulf %43, %44 : vector<8x32xf32>
    %46 = vector.broadcast %27 : vector<1x32xf32> to vector<8x32xf32>
    %47 = arith.addf %45, %46 : vector<8x32xf32>
    %c0_24 = arith.constant 0 : index
    %c0_25 = arith.constant 0 : index
    %c0_26 = arith.constant 0 : index
    %48 = vector.load %arg8[%c0_24, %c0_25, %c0_26] : memref<1x8x32xf32, #tpu.memory_space<vmem>>, vector<1x8x32xf32>
    %49 = vector.shape_cast %48 : vector<1x8x32xf32> to vector<8x32xf32>
    %50 = vector.shape_cast %47 : vector<8x32xf32> to vector<1x8x32xf32>
    tpu.vector_store %arg8[%c0_24, %c0_25, %c0_26], %50 {strides = array<i32>} : memref<1x8x32xf32, #tpu.memory_space<vmem>>, vector<1x8x32xf32>,
    return
  }
  func.func @transform_0(%arg0: i32) -> (i32, i32, i32) {
    %c0_i32 = arith.constant 0 : i32
    %c0_i32_0 = arith.constant 0 : i32
    %c0_i32_1 = arith.constant 0 : i32
    return %arg0, %c0_i32, %c0_i32_0 : i32, i32, i32
  }
  func.func @transform_1(%arg0: i32) -> (i32, i32) {
    %c0_i32 = arith.constant 0 : i32
    %c0_i32_0 = arith.constant 0 : i32
    %c0_i32_1 = arith.constant 0 : i32
    return %c0_i32, %c0_i32_0 : i32, i32
  }
  func.func @transform_2(%arg0: i32) -> (i32, i32) {
    %c0_i32 = arith.constant 0 : i32
    %c0_i32_0 = arith.constant 0 : i32
    %c0_i32_1 = arith.constant 0 : i32
    return %c0_i32, %c0_i32_0 : i32, i32
  }
  func.func @transform_3(%arg0: i32) -> (i32, i32) {
    %c0_i32 = arith.constant 0 : i32
    %c0_i32_0 = arith.constant 0 : i32
    %c0_i32_1 = arith.constant 0 : i32
    return %c0_i32, %c0_i32_0 : i32, i32
  }
  func.func @transform_4(%arg0: i32) -> (i32, i32) {
    %c0_i32 = arith.constant 0 : i32
    %c0_i32_0 = arith.constant 0 : i32
    %c0_i32_1 = arith.constant 0 : i32
    return %c0_i32, %c0_i32_0 : i32, i32
  }
  func.func @transform_5(%arg0: i32) -> (i32, i32) {
    %c0_i32 = arith.constant 0 : i32
    %c0_i32_0 = arith.constant 0 : i32
    %c0_i32_1 = arith.constant 0 : i32
    return %c0_i32, %c0_i32_0 : i32, i32
  }
  func.func @transform_6(%arg0: i32) -> (i32, i32) {
    %c0_i32 = arith.constant 0 : i32
    %c0_i32_0 = arith.constant 0 : i32
    %c0_i32_1 = arith.constant 0 : i32
    return %c0_i32, %c0_i32_0 : i32, i32
  }
  func.func @transform_7(%arg0: i32) -> (i32, i32, i32) {
    %c0_i32 = arith.constant 0 : i32
    %c0_i32_0 = arith.constant 0 : i32
    %c0_i32_1 = arith.constant 0 : i32
    return %arg0, %c0_i32, %c0_i32_0 : i32, i32, i32
  }
}

</mosaic_0001>

<bundles_post_ra>
// kernel: decoder_forward.15
= control target key start
LH: loop header
LB: loop body
LE: loop exit
PB: predicated region body
PF: predicated region fallthrough
CT: control target
= control target key end

     0   :  { %s407_s12 = smov 0   ;;  %s451_s0 = inlined_call_operand.vmem [shape: s32[2,8,1], index: 0, kind: input, shape index: {}]   ;;  %s452_s1 = inlined_call_operand.vmem [shape: f32[50,32], index: 1, kind: input, shape index: {}]   ;;  %s453_s2 = inlined_call_operand.vmem [shape: f32[8,32], index: 2, kind: input, shape index: {}]   ;;  %s454_s3 = inlined_call_operand.vmem [shape: f32[2,8,32], index: 3, kind: output, shape index: {}]  }
   0x1 LB: > { %s316_s13 = sadd.s32 4294967295, %s381_s12   ;;  %p320_p0 = scmp.ge.s32.totalorder %s381_s12, 1  ;;  %s381_s12 = sphi %s407_s12, %s13_s12  }
   0x2   : > { %p136_p1 = scmp.lt.s32.totalorder %s381_s12, 3 }
   0x4   : > { %p137_p2 = pnand %p320_p0, %p136_p1 }
   0x5   : > { %p158_p3 = scmp.lt.s32.totalorder (!%p137_p2), %s316_s13, 1  ;;  %v167_v0 = vld [vmem:[%s452_s1] sm:$0xff] (!%p137_p2)  ;;  %v168_v1 = vld [vmem:[%s452_s1 + $0x8] sm:$0xff] (!%p137_p2)  ;;  %v169_v2 = vld [vmem:[%s452_s1 + $0x10] sm:$0xff] (!%p137_p2)  ;;  %v383_v3 = vmov (!%p137_p2), 0   ;;  %v384_v4 = vmov (!%p137_p2), 0.0|0.0   ;;  %v174_v14 = vlaneseq (!%p137_p2) }
   0x6   : > { %140 = sbr.rel (%p137_p2) target bundleno = 362 (0x16a), region = 32  ;;  %374 = vset.pattern.permute.xlu0 (!%p137_p2), %v383_v3  ;;  %353 = vmatprep.subr.bf16.mxu0 (!%p137_p2), %v384_v4  ;;  %v354_v5 = vpack.c.bf16 (!%p137_p2), %v168_v1, %v167_v0  ;;  %v170_v6 = vld [vmem:[%s452_s1 + $0x18] sm:$0xff] (!%p137_p2)  ;;  %v171_v8 = vld [vmem:[%s452_s1 + $0x20] sm:$0xff] (!%p137_p2)  ;;  %v172_v9 = vld [vmem:[%s452_s1 + $0x28] sm:$0xff] (!%p137_p2)  ;;  %vm385_vm0 = vmmov (!%p137_p2), 0   ;;  %v386_v12 = vmov (!%p137_p2), 0.0  }
   0x7   : > { %v357_v7 = vpack.c.bf16 (!%p137_p2), %v170_v6, %v169_v2  ;;  %v360_v11 = vpack.c.bf16 (!%p137_p2), %v172_v9, %v171_v8  ;;  %350 = vmatprep.mubr.msk.f32.mxu0 (!%p137_p2), %vm385_vm0, %v386_v12  ;;  %v173_v13 = vld [vmem:[%s452_s1 + $0x30] sm:$0x3] (!%p137_p2)  ;;  %vm187_vm1 = vcmask (!%p137_p2), 1041408   ;;  %v175_v15 = vand.u32 (!%p137_p2), 127, %v174_v14  ;;  %v182_v18 = vld [vmem:[%s453_s2] sm:$0xff] (!%p137_p2) }
   0x8   : > { %355 = vmatpush3.bf16.msra.mxu0 (!%p137_p2), %v354_v5  ;;  %vm183_vm2 = vcmask (!%p137_p2), 408576   ;;  %vm261_vm4 = vcmask (!%p137_p2), 261120  }
   0x9   : > { %356 = vmatprep.subr.bf16.mxu0 (!%p137_p2), %v384_v4 }
   0xc   : > { %358 = vmatpush3.bf16.msra.mxu0 (!%p137_p2), %v357_v7 }
   0xd   : > { %s456_s13 = smov (!%p158_p3, %s316_s13), 1  ;;  %359 = vmatprep.subr.bf16.mxu0 %v384_v4 }
   0xe   : > { %s321_s22 = sshll.u32 %s456_s13, 3 }
   0xf   : > { %s161_s29 = scalar_lea.vmem %s451_s0, %s321_s22  ;;  %s165_s9 = scalar_lea.vmem %s454_s3, %s321_s22 }
  0x10   : > { %v166_v10 = vld [vmem:[%s161_s29] sm:$0xff]  ;;  %361 = vmatpush3.bf16.msra.mxu0 %v360_v11 }
  0x11   : > { %177 = vperm.xlu0 %374, %v166_v10   ;;  %348 = vmatprep.subr.mxu0 %v386_v12 }
  0x14   : > { %349 = vmatpush3.msk.msra.mxu0 %vm187_vm1, %v173_v13 }
  0x90   : > { %v178_v16 = vpop.permute.xlu0 %177 }
  0x91   : > { %vm179_vm3 = vcmp.eq.s32.totalorder %v178_v16, %v175_v15 }
  0x92   : > { %v323_v17 = vsel %vm179_vm3, 1.0, %v386_v12 }
  0x93   : > { %351 = vmatmul.mubr.msk.f32.vlgmr.msra.gmra.mrb[0].mxu0 %vm183_vm2, %v323_v17 }
 0x166   : > { %v257_v19 = vpop.f32.mrb[0].mxu0 }
 0x167   : > { %v258_v20 = vadd.f32 %v257_v19, %v182_v18  ;;  %v352_v21 = vpop.f32.mrb[1].mxu0 }
 0x169   : > { %262 = vst.msk [vmem:[%s165_s9] sm:$0xff] %vm261_vm4, %v258_v20 }
 0x16a PF: > { %s13_s12 = sadd.s32 1, %s381_s12  }
 0x16b   : > { %p10_p4 = scmp.ge.s32.totalorder %s13_s12, 4  }
 0x16d   :  { %12 = sbr.rel (!%p10_p4) target bundleno = 1 (0x1), region = 62 }

// kernel: decoder_forward.16
= control target key start
LH: loop header
LB: loop body
LE: loop exit
PB: predicated region body
PF: predicated region fallthrough
CT: control target
= control target key end

     0   :  { %s1002_s17 = smov 0   ;;  %s1093_s0 = inlined_call_operand.vmem [shape: f32[2,8,32], index: 0, kind: input, shape index: {}, may-alias: {0,1,2}]   ;;  %s1094_s1 = inlined_call_operand.vmem [shape: f32[2,8,32], index: 1, kind: input, shape index: {}, may-alias: {0,1,2}]   ;;  %s1095_s2 = inlined_call_operand.vmem [shape: f32[2,8,32], index: 2, kind: input, shape index: {}, may-alias: {0,1,2}]   ;;  %s1096_s3 = inlined_call_operand.vmem [shape: f32[32,32], index: 3, kind: input, shape index: {}]   ;;  %s1097_s4 = inlined_call_operand.vmem [shape: f32[1,32], index: 4, kind: input, shape index: {}]   ;;  %s1098_s5 = inlined_call_operand.vmem [shape: f32[32,32], index: 5, kind: input, shape index: {}]   ;;  %s1099_s6 = inlined_call_operand.vmem [shape: f32[1,32], index: 6, kind: input, shape index: {}]   ;;  %s1100_s7 = inlined_call_operand.vmem [shape: f32[32,32], index: 7, kind: input, shape index: {}]   ;;  %s1101_s8 = inlined_call_operand.vmem [shape: f32[1,32], index: 8, kind: input, shape index: {}]   ;;  %s1102_s9 = inlined_call_operand.vmem [shape: f32[2,8,32], index: 9, kind: output, shape index: {0}]   ;;  %s1103_s10 = inlined_call_operand.vmem [shape: f32[2,8,32], index: 10, kind: output, shape index: {1}]   ;;  %s1104_s11 = inlined_call_operand.vmem [shape: f32[2,8,32], index: 11, kind: output, shape index: {2}]  }
   0x1 LB: > { %s835_s18 = sadd.s32 4294967295, %s937_s17   ;;  %p839_p0 = scmp.ge.s32.totalorder %s937_s17, 1  ;;  %s937_s17 = sphi %s1002_s17, %s22_s17  }
   0x2   : > { %p359_p1 = scmp.lt.s32.totalorder %s937_s17, 3 }
   0x4   : > { %p360_p2 = pnand %p839_p0, %p359_p1 }
   0x5   : > { %v438_v0 = vld [vmem:[%s1096_s3] sm:$0xff] (!%p360_p2)  ;;  %v439_v1 = vld [vmem:[%s1096_s3 + $0x8] sm:$0xff] (!%p360_p2)  ;;  %v440_v2 = vld [vmem:[%s1096_s3 + $0x10] sm:$0xff] (!%p360_p2)  ;;  %v939_v3 = vmov (!%p360_p2), 0.0|0.0   ;;  %vm940_vm0 = vmmov (!%p360_p2), 0   ;;  %v941_v6 = vmov (!%p360_p2), 0.0  }
   0x6   : > { %363 = sbr.rel (%p360_p2) target bundleno = 240 (0xf0), region = 56  ;;  %902 = vmatprep.subr.bf16.mxu0 (!%p360_p2), %v939_v3  ;;  %v903_v4 = vpack.c.bf16 (!%p360_p2), %v439_v1, %v438_v0  ;;  %v441_v5 = vld [vmem:[%s1096_s3 + $0x18] sm:$0xff] (!%p360_p2)  ;;  %877 = vmatprep.mubr.msk.f32.mxu0 (!%p360_p2), %vm940_vm0, %v941_v6  ;;  %p413_p3 = scmp.lt.s32.totalorder (!%p360_p2), %s835_s18, 1  ;;  %v525_v7 = vld [vmem:[%s1098_s5] sm:$0xff] (!%p360_p2)  ;;  %v526_v8 = vld [vmem:[%s1098_s5 + $0x8] sm:$0xff] (!%p360_p2)  ;;  %vm449_vm1 = vcmask (!%p360_p2), 261120  }
   0x7   : > { %908 = vmatprep.subr.bf16.mxu1 (!%p360_p2), %v939_v3  ;;  %v909_v9 = vpack.c.bf16 (!%p360_p2), %v526_v8, %v525_v7  ;;  %v527_v10 = vld [vmem:[%s1098_s5 + $0x10] sm:$0xff] (!%p360_p2)  ;;  %888 = vmatprep.mubr.msk.f32.mxu1 (!%p360_p2), %vm940_vm0, %v941_v6  ;;  %v906_v11 = vpack.c.bf16 (!%p360_p2), %v441_v5, %v440_v2  ;;  %v528_v12 = vld [vmem:[%s1098_s5 + $0x18] sm:$0xff] (!%p360_p2)  ;;  %v611_v13 = vld [vmem:[%s1100_s7] sm:$0xff] (!%p360_p2) }
   0x8   : > { %904 = vmatpush3.bf16.msra.mxu0 (!%p360_p2), %v903_v4  ;;  %v612_v14 = vld [vmem:[%s1100_s7 + $0x8] sm:$0xff] (!%p360_p2)  ;;  %v912_v15 = vpack.c.bf16 (!%p360_p2), %v528_v12, %v527_v10  ;;  %v613_v18 = vld [vmem:[%s1100_s7 + $0x10] sm:$0xff] (!%p360_p2)  ;;  %v614_v19 = vld [vmem:[%s1100_s7 + $0x18] sm:$0xff] (!%p360_p2) }
   0x9   : > { %905 = vmatprep.subr.bf16.mxu0 (!%p360_p2), %v939_v3  ;;  %910 = vmatpush3.bf16.msra.mxu1 (!%p360_p2), %v909_v9  ;;  %v915_v17 = vpack.c.bf16 (!%p360_p2), %v612_v14, %v611_v13  ;;  %v918_v21 = vpack.c.bf16 (!%p360_p2), %v614_v19, %v613_v18  ;;  %v846_v23 = vld [vmem:[%s1097_s4] ss:$0 sm:$0xff] (!%p360_p2) }
   0xa   : > { %911 = vmatprep.subr.bf16.mxu1 (!%p360_p2), %v939_v3  ;;  %v848_v24 = vld [vmem:[%s1099_s6] ss:$0 sm:$0xff] (!%p360_p2) }
   0xb   : > { %v850_v31 = vld [vmem:[%s1101_s8] ss:$0 sm:$0xff] (!%p360_p2) }
   0xc   : > { %907 = vmatpush3.bf16.msra.mxu0 (!%p360_p2), %v906_v11 }
   0xd   : > { %s1106_s18 = smov (!%p413_p3, %s835_s18), 1  ;;  %914 = vmatprep.subr.bf16.mxu0 %v939_v3  ;;  %913 = vmatpush3.bf16.msra.mxu1 %v912_v15 }
   0xe   : > { %s1042_s22 = sshll.u32 %s1106_s18, 3 }
   0xf   : > { %s416_s25 = scalar_lea.vmem %s1093_s0, %s1042_s22  ;;  %s420_s28 = scalar_lea.vmem %s1094_s1, %s1042_s22 }
  0x10   : > { %v437_v16 = vld [vmem:[%s416_s25] sm:$0xff]  ;;  %s424_s15 = scalar_lea.vmem %s1095_s2, %s1042_s22  ;;  %s428_s25 = scalar_lea.vmem %s1102_s9, %s1042_s22 }
  0x11   : > { %v524_v20 = vld [vmem:[%s420_s28] sm:$0xff]  ;;  %878 = vmatmul.mubr.msk.f32.vlgmr.msra.gmra.mrb[0].mxu0 %vm449_vm1, %v437_v16  ;;  %s432_s28 = scalar_lea.vmem %s1103_s10, %s1042_s22  ;;  %s436_s13 = scalar_lea.vmem %s1104_s11, %s1042_s22 }
  0x12   : > { %916 = vmatpush3.bf16.msra.mxu0 %v915_v17  ;;  %889 = vmatmul.mubr.msk.f32.vlgmr.msra.gmra.mrb[0].mxu1 %vm449_vm1, %v524_v20  ;;  %v610_v22 = vld [vmem:[%s424_s15] sm:$0xff] }
  0x13   : > { %917 = vmatprep.subr.bf16.mxu0 %v939_v3  ;;  %899 = vmatprep.mubr.msk.f32.mxu0 %vm940_vm0, %v941_v6 }
  0x16   : > { %919 = vmatpush3.bf16.msra.mxu0 %v918_v21 }
  0x19   : > { %900 = vmatmul.mubr.msk.f32.vlgmr.msra.gmra.mrb[2].mxu0 %vm449_vm1, %v610_v22 }
  0xe4   : > { %v519_v25 = vpop.f32.mrb[0].mxu0 }
  0xe5   : > { %v520_v26 = vadd.f32 %v846_v23, %v519_v25  ;;  %v879_v27 = vpop.f32.mrb[1].mxu0  ;;  %v605_v28 = vpop.f32.mrb[0].mxu1 }
  0xe6   : > { %v606_v29 = vadd.f32 %v848_v24, %v605_v28  ;;  %v890_v30 = vpop.f32.mrb[1].mxu1 }
  0xe7   : > { %523 = vst.msk [vmem:[%s428_s25] sm:$0xff] %vm449_vm1, %v520_v26 }
  0xe8   : > { %609 = vst.msk [vmem:[%s432_s28] sm:$0xff] %vm449_vm1, %v606_v29 }
  0xec   : > { %v691_v32 = vpop.f32.mrb[2].mxu0 }
  0xed   : > { %v692_v33 = vadd.f32 %v850_v31, %v691_v32  ;;  %v901_v34 = vpop.f32.mrb[3].mxu0 }
  0xef   : > { %695 = vst.msk [vmem:[%s436_s13] sm:$0xff] %vm449_vm1, %v692_v33 }
  0xf0 PF: > { %s22_s17 = sadd.s32 1, %s937_s17  }
  0xf1   : > { %p19_p4 = scmp.ge.s32.totalorder %s22_s17, 4  }
  0xf3   :  { %21 = sbr.rel (!%p19_p4) target bundleno = 1 (0x1), region = 116 }

// kernel: decoder_forward.18
= control target key start
LH: loop header
LB: loop body
LE: loop exit
PB: predicated region body
PF: predicated region fallthrough
CT: control target
= control target key end

     0   :  { %s543_s21 = smov 0   ;;  %s593_s0 = inlined_call_operand.vmem [shape: f32[2,8,32], index: 0, kind: input, shape index: {}]   ;;  %s594_s1 = inlined_call_operand.vmem [shape: f32[2,8,32], index: 1, kind: input, shape index: {}]   ;;  %s595_s2 = inlined_call_operand.vmem [shape: f32[32,32], index: 2, kind: input, shape index: {}]   ;;  %s596_s3 = inlined_call_operand.vmem [shape: f32[1,32], index: 3, kind: input, shape index: {}]   ;;  %s597_s4 = inlined_call_operand.vmem [shape: f32[1,32], index: 4, kind: input, shape index: {}]   ;;  %s598_s5 = inlined_call_operand.vmem [shape: f32[1,32], index: 5, kind: input, shape index: {}]   ;;  %s599_s6 = inlined_call_operand.vmem [shape: f32[2,8,32], index: 6, kind: output, shape index: {}]  }
   0x1 LB: > { %s448_s22 = sadd.s32 4294967295, %s503_s21   ;;  %p452_p0 = scmp.ge.s32.totalorder %s503_s21, 1  ;;  %s503_s21 = sphi %s543_s21, %s16_s21  }
   0x2   : > { %p220_p1 = scmp.lt.s32.totalorder %s503_s21, 3 }
   0x4   : > { %p221_p2 = pnand %p452_p0, %p220_p1 }
   0x5   : > { %v265_v0 = vld [vmem:[%s595_s2] sm:$0xff] (!%p221_p2)  ;;  %v266_v1 = vld [vmem:[%s595_s2 + $0x8] sm:$0xff] (!%p221_p2)  ;;  %v267_v2 = vld [vmem:[%s595_s2 + $0x10] sm:$0xff] (!%p221_p2)  ;;  %v505_v3 = vmov (!%p221_p2), 0.0|0.0   ;;  %vm506_vm0 = vmmov (!%p221_p2), 0   ;;  %v507_v6 = vmov (!%p221_p2), 0.0  }
   0x6   : > { %224 = sbr.rel (%p221_p2) target bundleno = 547 (0x223), region = 44  ;;  %478 = vmatprep.subr.bf16.mxu0 (!%p221_p2), %v505_v3  ;;  %v479_v4 = vpack.c.bf16 (!%p221_p2), %v266_v1, %v265_v0  ;;  %v268_v5 = vld [vmem:[%s595_s2 + $0x18] sm:$0xff] (!%p221_p2)  ;;  %475 = vmatprep.mubr.msk.f32.mxu0 (!%p221_p2), %vm506_vm0, %v507_v6  ;;  %p252_p3 = scmp.lt.s32.totalorder (!%p221_p2), %s448_s22, 1  ;;  %vm276_vm1 = vcmask (!%p221_p2), 261120   ;;  %v456_v9 = vld [vmem:[%s596_s3] ss:$0 sm:$0xff] (!%p221_p2) }
   0x7   : > { %v482_v7 = vpack.c.bf16 (!%p221_p2), %v268_v5, %v267_v2  ;;  %v458_v25 = vld [vmem:[%s597_s4] ss:$0 sm:$0xff] (!%p221_p2) }
   0x8   : > { %480 = vmatpush3.bf16.msra.mxu0 (!%p221_p2), %v479_v4  ;;  %v459_v27 = vld [vmem:[%s598_s5] ss:$0 sm:$0xff] (!%p221_p2) }
   0x9   : > { %481 = vmatprep.subr.bf16.mxu0 (!%p221_p2), %v505_v3 }
   0xc   : > { %483 = vmatpush3.bf16.msra.mxu0 (!%p221_p2), %v482_v7 }
   0xd   : > { %s601_s22 = smov (!%p252_p3, %s448_s22), 1 }
   0xe   : > { %s563_s7 = sshll.u32 %s601_s22, 3 }
   0xf   : > { %s255_s10 = scalar_lea.vmem %s593_s0, %s563_s7  ;;  %s259_s13 = scalar_lea.vmem %s594_s1, %s563_s7 }
  0x10   : > { %v264_v8 = vld [vmem:[%s255_s10] sm:$0xff]  ;;  %s263_s23 = scalar_lea.vmem %s599_s6, %s563_s7 }
  0x11   : > { %476 = vmatmul.mubr.msk.f32.vlgmr.msra.gmra.mrb[0].mxu0 %vm276_vm1, %v264_v8  ;;  %v350_v11 = vld [vmem:[%s259_s13] sm:$0xff] }
  0xe4   : > { %v346_v10 = vpop.f32.mrb[0].mxu0 }
  0xe5   : > { %v347_v12 = vadd.f32 %v456_v9, %v346_v10  ;;  %v477_v13 = vpop.f32.mrb[1].mxu0 }
  0xe7   : > { %v351_v14 = vadd.f32 %v350_v11, %v347_v12 }
  0xe9   : > { %v354_v15 = vsel %vm276_vm1, %v351_v14, 0.0 }
  0xea   : > { %355 = vadd.xlane.f32.xlu0 %v354_v15 }
 0x177   : > { %v356_v16 = vpop.xlane.xlu0 %355 }
 0x178   : > { %v358_v17 = vmul.f32 0.03125, %v356_v16 }
 0x17a   : > { %v359_v18 = vsub.f32 %v351_v14, %v358_v17 }
 0x17c   : > { %v360_v19 = vmul.f32 %v359_v18, %v359_v18 }
 0x17e   : > { %v361_v20 = vsel %vm276_vm1, %v360_v19, 0.0 }
 0x17f   : > { %362 = vadd.xlane.f32.xlu0 %v361_v20 }
 0x20c   : > { %v363_v21 = vpop.xlane.xlu0 %362 }
 0x20d   : > { %v364_v22 = vmul.f32 0.03125, %v363_v21 }
 0x20f   : > { %v365_v23 = vadd.f32 1e-05, %v364_v22 }
 0x211   : > { %495 = vrsqrt.f32 %v365_v23 }
 0x21b   : > { %v496_v24 = vpop.eup %495 }
 0x21c   : > { %v367_v26 = vmul.f32 %v496_v24, %v359_v18 }
 0x21e   : > { %v374_v28 = vmul.f32 %v458_v25, %v367_v26 }
 0x220   : > { %v381_v29 = vadd.f32 %v459_v27, %v374_v28 }
 0x222   : > { %382 = vst.msk [vmem:[%s263_s23] sm:$0xff] %vm276_vm1, %v381_v29 }
 0x223 PF: > { %s16_s21 = sadd.s32 1, %s503_s21  }
 0x224   : > { %p13_p4 = scmp.ge.s32.totalorder %s16_s21, 4  }
 0x226   :  { %15 = sbr.rel (!%p13_p4) target bundleno = 1 (0x1), region = 77 }

// kernel: decoder_forward.17
= control target key start
LH: loop header
LB: loop body
LE: loop exit
PB: predicated region body
PF: predicated region fallthrough
CT: control target
= control target key end

     0   :  { %11 = vsyncpa [#allocation3], 0  ;;  %s886_s0 = inlined_call_operand.vmem [shape: f32[4,8,16], index: 0, kind: input, shape index: {}]   ;;  %s887_s1 = inlined_call_operand.vmem [shape: f32[4,8,16], index: 1, kind: input, shape index: {}]   ;;  %s888_s2 = inlined_call_operand.vmem [shape: f32[4,8,16], index: 2, kind: input, shape index: {}]   ;;  %s889_s3 = inlined_call_operand.vmem [shape: s32[4,8,8], index: 3, kind: input, shape index: {}]   ;;  %s890_s4 = inlined_call_operand.vmem [shape: f32[4,8,16], index: 4, kind: output, shape index: {0}]   ;;  %s891_s5 = inlined_call_operand.hbm [shape: f32[4,8,8], index: 5, kind: output, shape index: {1}]  }
   0x1   :  { %13 = vsyncpa [#allocation3 + $0x1], 0  ;;  %s766_s18 = smov 0   ;;  %s768_s19 = smov 0  }
   0x2   :  { %s770_s20 = smov 0   ;;  %s772_s21 = smov 0  }
   0x3 LB: > { %s787_s22 = sadd.s32 4294967295, %s731_s21   ;;  %s593_s23 = sadd.s32 4294967294, %s731_s21   ;;  %s731_s21 = sphi %s772_s21, %s897_s21   ;;  %s727_s20 = sphi %s770_s20, %s896_s20   ;;  %s723_s19 = sphi %s768_s19, %s895_s19   ;;  %s719_s18 = sphi %s766_s18, %s894_s18  }
   0x4   : > { %s791_s24 = sadd.s32 1, %s731_s21   ;;  %s156_s25 = sadd.s32 1, %s727_s20 }
   0x5   : > { %s153_s26 = ssub.s32 %s731_s21, %s791_s24  ;;  %p166_p0 = scmp.ne.s32.totalorder %s727_s20, %s723_s19 }
   0x6   : > { %p154_p1 = scmp.eq.s32.totalorder %s153_s26, 0  ;;  %p167_p2 = scmp.eq.s32.totalorder %s787_s22, 3 }
   0x7   : > { %p172_p3 = scmp.ne.s32.totalorder %s723_s19, %s719_s18  ;;  %p173_p4 = scmp.eq.s32.totalorder %s593_s23, 3 }
   0x8   : > { %s802_s27 = scalar_select %p154_p1, %s727_s20, %s156_s25  }
   0x9   : > { %p804_p5 = por %p167_p2, %p166_p0  ;;  %p808_p6 = por %p173_p4, %p172_p3 }
   0xa   : > { %p596_p7 = scmp.ge.s32.totalorder %s731_s21, 1  ;;  %p219_p8 = scmp.lt.s32.totalorder %s731_s21, 5 }
   0xc   : > { %p220_p9 = pnand %p596_p7, %p219_p8 }
   0xd   : > { %p262_p10 = scmp.lt.s32.totalorder (!%p220_p9), %s787_s22, 3  ;;  %v733_v0 = vmov (!%p220_p9), 0.0   ;;  %vm734_vm0 = vmmov (!%p220_p9), 0   ;;  %vm285_vm1 = vcmask (!%p220_p9), 130048   ;;  %vm366_vm3 = vcmask (!%p220_p9), 64512   ;;  %s259_s25 = sand.u32 (!%p220_p9), 1, %s723_s19  }
   0xe   : > { %223 = sbr.rel (%p220_p9) target bundleno = 771 (0x303), region = 36  ;;  %614 = vmatprep.subr.mxu0 (!%p220_p9), %v733_v0  ;;  %616 = vmatprep.mubr.msk.f32.mxu0 (!%p220_p9), %vm734_vm0, %v733_v0  ;;  %s597_s26 = sshll.u32 (!%p220_p9), %s259_s25, 3 }
   0xf   : > { %619 = vmatprep.subr.mxu1 (!%p220_p9), %v733_v0  ;;  %621 = vmatprep.mubr.msk.f32.mxu1 (!%p220_p9), %vm734_vm0, %v733_v0  ;;  %s607_s7 = sshll.u32 (!%p220_p9), %s787_s22, 7  ;;  %s735_s14 = smov (!%p220_p9), [#allocation2]  }
  0x10   : > { %s845_s11 = scalar_lea.hbm (!%p220_p9), %s891_s5, %s607_s7 }
  0x15   : > { %s263_s30 = scalar_select %p262_p10, %s787_s22, 3 }
  0x17   : > { %s816_s6 = sshll.u32 %s263_s30, 3  ;;  %s261_s30 = scalar_lea.vmem [#allocation2], %s597_s26 }
  0x18   : > { %s269_s9 = scalar_lea.vmem %s887_s1, %s816_s6  ;;  %s265_s12 = scalar_lea.vmem %s886_s0, %s816_s6 }
  0x19   : > { %v283_v1 = vld [vmem:[%s269_s9] sm:$0xff]  ;;  %s277_s15 = scalar_lea.vmem %s889_s3, %s816_s6  ;;  %s273_s23 = scalar_lea.vmem %s888_s2, %s816_s6 }
  0x1a   : > { %615 = vmatpush3.xpose.msk.msra.mxu0 %vm285_vm1, %v283_v1  ;;  %v282_v2 = vld [vmem:[%s265_s12] sm:$0xff]  ;;  %s474_s8 = sshll.u32 %s261_s30, 4  ;;  %s458_s12 = scalar_lea.sflag [#allocation3], %s259_s25  ;;  %s475_s8 = int_to_ptr.vmem [resolvable:$true] %s474_s8 }
  0x1b   : > { %v363_v3 = vld [vmem:[%s277_s15] sm:$0xff]  ;;  %s669_s13 = scalar_lea.vmem %s475_s8, 128  ;;  %s673_s15 = sshll.u32 %s735_s14, 4  ;;  %s674_s15 = int_to_ptr.vmem [resolvable:$false] %s673_s15 }
  0x1c   : > { %vm364_vm2 = vcmp.ne.s32.totalorder %v363_v3, 0  ;;  %v284_v14 = vld [vmem:[%s273_s23] sm:$0xff]  ;;  %p670_p11 = scmp.ne.s32.totalorder %s475_s8, %s669_s13  ;;  %s675_s16 = scalar_lea.vmem %s674_s15, 256 }
  0x1d   : > { %617 = vmatmul.mubr.msk.f32.vlgmr.msra.gmra.mrb[0].mxu0 %vm285_vm1, %v282_v2  ;;  %620 = vmatpush3.msra.mxu1 %v284_v14  ;;  %p676_p0 = scmp.lt.s32.totalorder %s475_s8, %s674_s15  ;;  %p677_p1 = scmp.lt.s32.totalorder %s675_s16, %s669_s13 }
  0x1e   : > { %p671_p12 = pnand %p670_p11, %p804_p5 }
  0x1f   : > { %p678_p2 = por %p677_p1, %p676_p0 }
  0x20   : > { %p672_p13 = pneg %p671_p12 }
  0x22   : > { %p679_p3 = pnand %p678_p2, %p672_p13 }
  0xf0   : > { %v358_v4 = vpop.f32.mrb[0].mxu0 }
  0xf1   : > { %v362_v5 = vmul.f32 0.35355338, %v358_v4  ;;  %v618_v6 = vpop.f32.mrb[1].mxu0 }
  0xf3   : > { %v365_v7 = vsel %vm364_vm2, -1e+09, %v362_v5 }
  0xf4   : > { %v367_v8 = vsel %vm366_vm3, %v365_v7, -inf }
  0xf5   : > { %368 = vmax.xlane.f32.xlu0 %v367_v8 }
 0x182   : > { %v369_v9 = vpop.xlane.xlu0 %368 }
 0x183   : > { %v370_v10 = vsub.f32 %v365_v7, %v369_v9 }
 0x185   : > { %v371_v11 = vmul.f32 1.442695, %v370_v10 }
 0x187   : > { %665 = vpow2.f32 %v371_v11 }
 0x191   : > { %v666_v12 = vpop.eup %665 }
 0x192   : > { %v373_v13 = vsel %vm366_vm3, %v666_v12, 0.0 }
 0x193   : > { %374 = vadd.xlane.f32.xlu0 %v373_v13 }
 0x220   : > { %v375_v15 = vpop.xlane.xlu0 %374 }
 0x221   : > { %667 = vrcp.f32 %v375_v15 }
 0x22b   : > { %v668_v16 = vpop.eup %667 }
 0x22c   : > { %v377_v17 = vmul.f32 %v668_v16, %v666_v12 }
 0x22e   : > { %622 = vmatmul.mubr.msk.f32.vlgmr.msra.gmra.mrb[0].mxu1 %vm366_vm3, %v377_v17  ;;  %452 = vst.msk [vmem:[%s261_s30] sm:$0xff] %vm366_vm3, %v377_v17 }
 0x22f   : > { %682 = shalt.err (!%p679_p3)
}
 0x230   : > { %s683_s22 = scalar_lea.hbm %s845_s11, 128  ;;  %s687_s25 = scalar_lea.hbm %s891_s5, 512 }
 0x231   : > { %p684_p4 = scmp.ne.s32.totalorder %s845_s11, %s683_s22  ;;  %p688_p9 = scmp.lt.u32.totalorder %s845_s11, %s891_s5 }
 0x232   : > { %p689_p10 = scmp.lt.u32.totalorder %s687_s25, %s683_s22  ;;  %p691_p12 = scmp.lt.u32.totalorder %s683_s22, %s845_s11 }
 0x233   : > { %p685_p7 = pnand %p684_p4, %p804_p5 }
 0x234   : > { %p690_p11 = por %p689_p10, %p688_p9 }
 0x235   : > { %p686_p8 = pneg %p685_p7 }
 0x236   : > { %p692_p13 = por %p691_p12, %p690_p11 }
 0x238   : > { %p693_p0 = pnand %p692_p13, %p686_p8 }
 0x23a   : > { %696 = shalt.err (!%p693_p0)
}
 0x23b   : > { %624 = dma.vmem_to_hbm [thread:$0]  (%p804_p5), %s475_s8, 128, %s845_s11, %s458_s12  }
 0x23c   : > { %s281_s10 = scalar_lea.vmem %s890_s4, %s816_s6 }
 0x301   : > { %v447_v18 = vpop.f32.mrb[0].mxu1 }
 0x302   : > { %451 = vst.msk [vmem:[%s281_s10] sm:$0xff] %vm285_vm1, %v447_v18  ;;  %v623_v19 = vpop.f32.mrb[1].mxu1 }
 0x303 PF: > { %p630_p1 = scmp.ge.s32.totalorder %s731_s21, 2  ;;  %s493_s13 = sand.u32 1, %s719_s18  }
 0x304   : > { %s494_s28 = scalar_lea.sflag [#allocation3], %s493_s13 }
 0x305   : > { %p627_p2 = pnand %p630_p1, %p808_p6 }
 0x307   : > { %714 = dma.done.wait (!%p627_p2), %s494_s28, 128  }
 0x308   : > { %716 = vsyncadd (!%p627_p2), %s494_s28, 4294967168  ;;  %p16_p5 = scmp.ge.s32.totalorder %s791_s24, 6   ;;  %s894_s18 = smov %s723_s19 }
 0x309   : > { %s895_s19 = smov %s727_s20  ;;  %s896_s20 = smov %s802_s27 }
 0x30a   : > { %s897_s21 = smov %s791_s24  ;;  %18 = sbr.rel (!%p16_p5) target bundleno = 3 (0x3), region = 92 }
 0x311   :  { %499 = vsyncpa [#allocation3], 1 }
 0x312   :  { %501 = vsyncpa [#allocation3 + $0x1], 1 }

// kernel: decoder_forward.19
= control target key start
LH: loop header
LB: loop body
LE: loop exit
PB: predicated region body
PF: predicated region fallthrough
CT: control target
= control target key end

     0   :  { %s1053_s17 = smov 0   ;;  %s1145_s0 = inlined_call_operand.vmem [shape: f32[2,8,32], index: 0, kind: input, shape index: {}]   ;;  %s1146_s1 = inlined_call_operand.vmem [shape: f32[2,12,32], index: 1, kind: input, shape index: {}, may-alias: {1,2}]   ;;  %s1147_s2 = inlined_call_operand.vmem [shape: f32[2,12,32], index: 2, kind: input, shape index: {}, may-alias: {1,2}]   ;;  %s1148_s3 = inlined_call_operand.vmem [shape: f32[32,32], index: 3, kind: input, shape index: {}]   ;;  %s1149_s4 = inlined_call_operand.vmem [shape: f32[1,32], index: 4, kind: input, shape index: {}]   ;;  %s1150_s5 = inlined_call_operand.vmem [shape: f32[32,32], index: 5, kind: input, shape index: {}]   ;;  %s1151_s6 = inlined_call_operand.vmem [shape: f32[1,32], index: 6, kind: input, shape index: {}]   ;;  %s1152_s7 = inlined_call_operand.vmem [shape: f32[32,32], index: 7, kind: input, shape index: {}]   ;;  %s1153_s8 = inlined_call_operand.vmem [shape: f32[1,32], index: 8, kind: input, shape index: {}]   ;;  %s1154_s9 = inlined_call_operand.vmem [shape: f32[2,8,32], index: 9, kind: output, shape index: {0}]   ;;  %s1155_s10 = inlined_call_operand.vmem [shape: f32[2,12,32], index: 10, kind: output, shape index: {1}]   ;;  %s1156_s11 = inlined_call_operand.vmem [shape: f32[2,12,32], index: 11, kind: output, shape index: {2}]  }
   0x1 LB: > { %s870_s18 = sadd.s32 4294967295, %s988_s17   ;;  %p874_p0 = scmp.ge.s32.totalorder %s988_s17, 1  ;;  %s988_s17 = sphi %s1053_s17, %s22_s17  }
   0x2   : > { %p361_p1 = scmp.lt.s32.totalorder %s988_s17, 3 }
   0x4   : > { %p362_p2 = pnand %p874_p0, %p361_p1 }
   0x5   : > { %v448_v0 = vld [vmem:[%s1148_s3] sm:$0xff] (!%p362_p2)  ;;  %v449_v1 = vld [vmem:[%s1148_s3 + $0x8] sm:$0xff] (!%p362_p2)  ;;  %v450_v2 = vld [vmem:[%s1148_s3 + $0x10] sm:$0xff] (!%p362_p2)  ;;  %v990_v3 = vmov (!%p362_p2), 0.0|0.0   ;;  %vm991_vm0 = vmmov (!%p362_p2), 0   ;;  %v992_v6 = vmov (!%p362_p2), 0.0  }
   0x6   : > { %365 = sbr.rel (%p362_p2) target bundleno = 241 (0xf1), region = 56  ;;  %949 = vmatprep.subr.bf16.mxu0 (!%p362_p2), %v990_v3  ;;  %v950_v4 = vpack.c.bf16 (!%p362_p2), %v449_v1, %v448_v0  ;;  %v451_v5 = vld [vmem:[%s1148_s3 + $0x18] sm:$0xff] (!%p362_p2)  ;;  %924 = vmatprep.mubr.msk.f32.mxu0 (!%p362_p2), %vm991_vm0, %v992_v6  ;;  %v536_v7 = vld [vmem:[%s1150_s5] sm:$0xff] (!%p362_p2)  ;;  %v537_v8 = vld [vmem:[%s1150_s5 + $0x8] sm:$0xff] (!%p362_p2)  ;;  %p419_p3 = scmp.lt.s32.totalorder (!%p362_p2), %s870_s18, 1  ;;  %vm459_vm1 = vcmask (!%p362_p2), 261120  }
   0x7   : > { %v955_v9 = vpack.c.bf16 (!%p362_p2), %v537_v8, %v536_v7  ;;  %v633_v10 = vld [vmem:[%s1152_s7] sm:$0xff] (!%p362_p2)  ;;  %v634_v11 = vld [vmem:[%s1152_s7 + $0x8] sm:$0xff] (!%p362_p2)  ;;  %v538_v12 = vld [vmem:[%s1150_s5 + $0x10] sm:$0xff] (!%p362_p2)  ;;  %v953_v13 = vpack.c.bf16 (!%p362_p2), %v451_v5, %v450_v2  ;;  %vm629_vm2 = vcmask (!%p362_p2), 257024  }
   0x8   : > { %951 = vmatpush3.bf16.msra.mxu0 (!%p362_p2), %v950_v4  ;;  %v539_v14 = vld [vmem:[%s1150_s5 + $0x18] sm:$0xff] (!%p362_p2)  ;;  %v963_v15 = vpack.c.bf16 (!%p362_p2), %v634_v11, %v633_v10  ;;  %v635_v17 = vld [vmem:[%s1152_s7 + $0x10] sm:$0xff] (!%p362_p2)  ;;  %v885_v25 = vld [vmem:[%s1149_s4] ss:$0 sm:$0xff] (!%p362_p2) }
   0x9   : > { %952 = vmatprep.subr.bf16.mxu0 (!%p362_p2), %v990_v3  ;;  %956 = vmatprep.subr.bf16.mxu1 (!%p362_p2), %v955_v9  ;;  %v959_v16 = vpack.c.bf16 (!%p362_p2), %v539_v14, %v538_v12  ;;  %v636_v18 = vld [vmem:[%s1152_s7 + $0x18] sm:$0xff] (!%p362_p2)  ;;  %v887_v27 = vld [vmem:[%s1151_s6] ss:$0 sm:$0xff] (!%p362_p2) }
   0xa   : > { %958 = vmatpush3.bf16.msra.mxu1 (!%p362_p2), %v955_v9  ;;  %v967_v20 = vpack.c.bf16 (!%p362_p2), %v636_v18, %v635_v17  ;;  %v890_v34 = vld [vmem:[%s1153_s8] ss:$0 sm:$0xff] (!%p362_p2) }
   0xb   : > { %960 = vmatprep.subr.bf16.mxu1 (!%p362_p2), %v959_v16 }
   0xc   : > { %954 = vmatpush3.bf16.msra.mxu0 (!%p362_p2), %v953_v13 }
   0xd   : > { %s1158_s18 = smov (!%p419_p3, %s870_s18), 1  ;;  %964 = vmatprep.subr.bf16.mxu0 %v963_v15 }
   0xe   : > { %s875_s22 = sshll.u32 %s1158_s18, 3  ;;  %s1101_s27 = sshll.u32 %s1158_s18, 4  ;;  %962 = vmatpush3.bf16.msra.mxu1 %v959_v16 }
   0xf   : > { %s422_s30 = scalar_lea.vmem %s1145_s0, %s875_s22  ;;  %s427_s14 = scalar_lea.vmem %s1146_s1, %s1101_s27 }
  0x10   : > { %v447_v19 = vld [vmem:[%s422_s30] sm:$0xff]  ;;  %s432_s19 = scalar_lea.vmem %s1147_s2, %s1101_s27  ;;  %v535_v23 = vld [vmem:[%s427_s14 + $0x8] sm:$0xf]  ;;  %s436_s24 = scalar_lea.vmem %s1154_s9, %s875_s22 }
  0x11   : > { %v534_v21 = vld [vmem:[%s427_s14] sm:$0xff]  ;;  %925 = vmatmul.mubr.msk.f32.vlgmr.msra.gmra.mrb[0].mxu0 %vm459_vm1, %v447_v19  ;;  %v632_v24 = vld [vmem:[%s432_s19 + $0x8] sm:$0xf]  ;;  %s441_s30 = scalar_lea.vmem %s1155_s10, %s1101_s27  ;;  %s446_s15 = scalar_lea.vmem %s1156_s11, %s1101_s27 }
  0x12   : > { %v631_v22 = vld [vmem:[%s432_s19] sm:$0xff]  ;;  %935 = vmatprep.mubr.msk.f32.mxu1 %vm459_vm1, %v534_v21  ;;  %966 = vmatpush3.bf16.msra.mxu0 %v963_v15 }
  0x13   : > { %946 = vmatprep.mubr.msk.f32.mxu0 %vm459_vm1, %v631_v22  ;;  %968 = vmatprep.subr.bf16.mxu0 %v967_v20 }
  0x14   : > { %936 = vmatmul.mubr.msk.f32.vlgmr.msra.gmra.mrb[0].mxu1 %vm459_vm1, %v535_v23 }
  0x16   : > { %970 = vmatpush3.bf16.msra.mxu0 %v967_v20 }
  0x19   : > { %947 = vmatmul.mubr.msk.f32.vlgmr.msra.gmra.mrb[2].mxu0 %vm459_vm1, %v632_v24 }
  0xe4   : > { %v529_v26 = vpop.f32.mrb[0].mxu0 }
  0xe5   : > { %v530_v28 = vadd.f32 %v885_v25, %v529_v26  ;;  %v926_v29 = vpop.f32.mrb[1].mxu0 }
  0xe7   : > { %v937_v30 = vpop.f32.mrb[0].mxu1  ;;  %533 = vst.msk [vmem:[%s436_s24] sm:$0xff] %vm459_vm1, %v530_v28 }
  0xe8   : > { %v625_v31 = vadd.f32 %v937_v30, %v887_v27  ;;  %v619_v32 = vpop.f32.mrb[1].mxu1 }
  0xe9   : > { %v620_v33 = vadd.f32 %v887_v27, %v619_v32 }
  0xea   : > { %630 = vst.msk [vmem:[%s441_s30 + $0x8] sm:$0xf] %vm629_vm2, %v625_v31 }
  0xeb   : > { %628 = vst.msk [vmem:[%s441_s30] sm:$0xff] %vm459_vm1, %v620_v33 }
  0xec   : > { %v948_v35 = vpop.f32.mrb[2].mxu0 }
  0xed   : > { %v722_v36 = vadd.f32 %v948_v35, %v890_v34  ;;  %v716_v37 = vpop.f32.mrb[3].mxu0 }
  0xee   : > { %v717_v38 = vadd.f32 %v890_v34, %v716_v37 }
  0xef   : > { %726 = vst.msk [vmem:[%s446_s15 + $0x8] sm:$0xf] %vm629_vm2, %v722_v36 }
  0xf0   : > { %725 = vst.msk [vmem:[%s446_s15] sm:$0xff] %vm459_vm1, %v717_v38 }
  0xf1 PF: > { %s22_s17 = sadd.s32 1, %s988_s17  }
  0xf2   : > { %p19_p4 = scmp.ge.s32.totalorder %s22_s17, 4  }
  0xf4   :  { %21 = sbr.rel (!%p19_p4) target bundleno = 1 (0x1), region = 116 }

// kernel: decoder_forward.20
= control target key start
LH: loop header
LB: loop body
LE: loop exit
PB: predicated region body
PF: predicated region fallthrough
CT: control target
= control target key end

     0   :  { %11 = vsyncpa [#allocation3], 0  ;;  %s928_s0 = inlined_call_operand.vmem [shape: f32[4,8,16], index: 0, kind: input, shape index: {}]   ;;  %s929_s1 = inlined_call_operand.vmem [shape: f32[4,12,16], index: 1, kind: input, shape index: {}]   ;;  %s930_s2 = inlined_call_operand.vmem [shape: f32[4,12,16], index: 2, kind: input, shape index: {}]   ;;  %s931_s3 = inlined_call_operand.vmem [shape: s32[4,8,12], index: 3, kind: input, shape index: {}]   ;;  %s932_s4 = inlined_call_operand.vmem [shape: f32[4,8,16], index: 4, kind: output, shape index: {0}]   ;;  %s933_s5 = inlined_call_operand.hbm [shape: f32[4,8,12], index: 5, kind: output, shape index: {1}]  }
   0x1   :  { %13 = vsyncpa [#allocation3 + $0x1], 0  ;;  %s805_s18 = smov 0   ;;  %s807_s19 = smov 0  }
   0x2   :  { %s809_s20 = smov 0   ;;  %s811_s21 = smov 0  }
   0x3 LB: > { %s826_s22 = sadd.s32 4294967295, %s768_s21   ;;  %s608_s23 = sadd.s32 4294967294, %s768_s21   ;;  %s768_s21 = sphi %s811_s21, %s939_s21   ;;  %s764_s20 = sphi %s809_s20, %s938_s20   ;;  %s760_s19 = sphi %s807_s19, %s937_s19   ;;  %s756_s18 = sphi %s805_s18, %s936_s18  }
   0x4   : > { %s830_s24 = sadd.s32 1, %s768_s21   ;;  %s156_s25 = sadd.s32 1, %s764_s20 }
   0x5   : > { %s153_s26 = ssub.s32 %s768_s21, %s830_s24  ;;  %p166_p0 = scmp.ne.s32.totalorder %s764_s20, %s760_s19 }
   0x6   : > { %p154_p1 = scmp.eq.s32.totalorder %s153_s26, 0  ;;  %p167_p2 = scmp.eq.s32.totalorder %s826_s22, 3 }
   0x7   : > { %p172_p3 = scmp.ne.s32.totalorder %s760_s19, %s756_s18  ;;  %p173_p4 = scmp.eq.s32.totalorder %s608_s23, 3 }
   0x8   : > { %s841_s27 = scalar_select %p154_p1, %s764_s20, %s156_s25  }
   0x9   : > { %p843_p5 = por %p167_p2, %p166_p0  ;;  %p847_p6 = por %p173_p4, %p172_p3 }
   0xa   : > { %p611_p7 = scmp.ge.s32.totalorder %s768_s21, 1  ;;  %p221_p8 = scmp.lt.s32.totalorder %s768_s21, 5 }
   0xc   : > { %p222_p9 = pnand %p611_p7, %p221_p8 }
   0xd   : > { %p266_p10 = scmp.lt.s32.totalorder (!%p222_p9), %s826_s22, 3  ;;  %v770_v0 = vmov (!%p222_p9), 0.0|0.0   ;;  %vm771_vm0 = vmmov (!%p222_p9), 0   ;;  %v772_v1 = vmov (!%p222_p9), 0.0   ;;  %vm293_vm1 = vcmask (!%p222_p9), 130048   ;;  %s263_s26 = sand.u32 (!%p222_p9), 1, %s760_s19  }
   0xe   : > { %225 = sbr.rel (%p222_p9) target bundleno = 777 (0x309), region = 36  ;;  %651 = vmatprep.subr.bf16.mxu0 (!%p222_p9), %v770_v0  ;;  %641 = vmatprep.mubr.msk.f32.mxu0 (!%p222_p9), %vm771_vm0, %v772_v1  ;;  %vm653_vm2 = vmpackc.low (!%p222_p9), %vm293_vm1, %vm293_vm1  ;;  %vm377_vm4 = vcmask (!%p222_p9), 97280   ;;  %vm392_vm5 = vcmask (!%p222_p9), 1043456   ;;  %vm773_vm6 = vmmov (!%p222_p9), 1   ;;  %s774_s15 = smov (!%p222_p9), [#allocation2]  }
   0xf   : > { %655 = vmatprep.subr.bf16.mxu1 (!%p222_p9), %v770_v0  ;;  %648 = vmatprep.mubr.msk.f32.mxu1 (!%p222_p9), %vm771_vm0, %v772_v1  ;;  %vm657_vm7 = vmpackc.low (!%p222_p9), %vm392_vm5, %vm773_vm6 }
  0x15   : > { %s855_s30 = scalar_select %p266_p10, %s826_s22, 3 }
  0x17   : > { %s629_s6 = sshll.u32 %s855_s30, 4  ;;  %s864_s10 = sshll.u32 %s855_s30, 3 }
  0x18   : > { %s274_s9 = scalar_lea.vmem %s929_s1, %s629_s6  ;;  %s269_s13 = scalar_lea.vmem %s928_s0, %s864_s10 }
  0x19   : > { %v289_v2 = vld [vmem:[%s274_s9] sm:$0xff]  ;;  %v290_v3 = vld [vmem:[%s274_s9 + $0x8] sm:$0xf]  ;;  %s283_s16 = scalar_lea.vmem %s931_s3, %s864_s10  ;;  %s279_s25 = scalar_lea.vmem %s930_s2, %s629_s6 }
  0x1a   : > { %v652_v4 = vpack.c.bf16 %v290_v3, %v289_v2  ;;  %v288_v5 = vld [vmem:[%s269_s13] sm:$0xff]  ;;  %v292_v18 = vld [vmem:[%s279_s25 + $0x8] sm:$0xf]  ;;  %s612_s30 = sshll.u32 %s263_s26, 3  ;;  %s626_s6 = sshll.u32 %s826_s22, 7 }
  0x1b   : > { %v374_v6 = vld [vmem:[%s283_s16] sm:$0xff]  ;;  %s265_s7 = scalar_lea.vmem [#allocation2], %s612_s30  ;;  %s887_s12 = scalar_lea.hbm %s933_s5, %s626_s6 }
  0x1c   : > { %654 = vmatpush3.bf16.xpose.msk.msra.mxu0 %vm653_vm2, %v652_v4  ;;  %vm375_vm3 = vcmp.ne.s32.totalorder %v374_v6, 0  ;;  %v291_v17 = vld [vmem:[%s279_s25] sm:$0xff]  ;;  %s489_s8 = sshll.u32 %s265_s7, 4  ;;  %s473_s13 = scalar_lea.sflag [#allocation3], %s263_s26  ;;  %s490_s8 = int_to_ptr.vmem [resolvable:$true] %s489_s8 }
  0x1d   : > { %v656_v19 = vpack.c.bf16 %v292_v18, %v291_v17  ;;  %s706_s14 = scalar_lea.vmem %s490_s8, 128  ;;  %s710_s16 = sshll.u32 %s774_s15, 4  ;;  %s711_s16 = int_to_ptr.vmem [resolvable:$false] %s710_s16 }
  0x1e   : > { %p707_p11 = scmp.ne.s32.totalorder %s490_s8, %s706_s14  ;;  %s712_s17 = scalar_lea.vmem %s711_s16, 256 }
  0x1f   : > { %658 = vmatpush3.bf16.msk.msra.mxu1 %vm657_vm7, %v656_v19  ;;  %p713_p0 = scmp.lt.s32.totalorder %s490_s8, %s711_s16  ;;  %p714_p1 = scmp.lt.s32.totalorder %s712_s17, %s706_s14 }
  0x20   : > { %p708_p12 = pnand %p707_p11, %p843_p5 }
  0x21   : > { %p715_p2 = por %p714_p1, %p713_p0 }
  0x22   : > { %p709_p13 = pneg %p708_p12 }
  0x23   : > { %642 = vmatmul.mubr.msk.f32.vlgmr.msra.gmra.mrb[0].mxu0 %vm293_vm1, %v288_v5 }
  0x24   : > { %p716_p3 = pnand %p715_p2, %p709_p13 }
  0xf6   : > { %v369_v7 = vpop.f32.mrb[0].mxu0 }
  0xf7   : > { %v373_v8 = vmul.f32 0.35355338, %v369_v7  ;;  %v643_v9 = vpop.f32.mrb[1].mxu0 }
  0xf9   : > { %v376_v10 = vsel %vm375_vm3, -1e+09, %v373_v8 }
  0xfa   : > { %v378_v11 = vsel %vm377_vm4, %v376_v10, -inf }
  0xfb   : > { %379 = vmax.xlane.f32.xlu0 %v378_v11 }
 0x188   : > { %v380_v12 = vpop.xlane.xlu0 %379 }
 0x189   : > { %v381_v13 = vsub.f32 %v376_v10, %v380_v12 }
 0x18b   : > { %v382_v14 = vmul.f32 1.442695, %v381_v13 }
 0x18d   : > { %702 = vpow2.f32 %v382_v14 }
 0x197   : > { %v703_v15 = vpop.eup %702 }
 0x198   : > { %v384_v16 = vsel %vm377_vm4, %v703_v15, 0.0 }
 0x199   : > { %385 = vadd.xlane.f32.xlu0 %v384_v16 }
 0x226   : > { %v386_v20 = vpop.xlane.xlu0 %385 }
 0x227   : > { %704 = vrcp.f32 %v386_v20 }
 0x231   : > { %v705_v21 = vpop.eup %704 }
 0x232   : > { %v388_v22 = vmul.f32 %v705_v21, %v703_v15 }
 0x234   : > { %649 = vmatmul.mubr.msk.f32.vlgmr.msra.gmra.mrb[0].mxu1 %vm377_vm4, %v388_v22  ;;  %467 = vst.msk [vmem:[%s265_s7] sm:$0xff] %vm377_vm4, %v388_v22 }
 0x235   : > { %719 = shalt.err (!%p716_p3)
}
 0x236   : > { %s720_s22 = scalar_lea.hbm %s887_s12, 128  ;;  %s724_s26 = scalar_lea.hbm %s933_s5, 512 }
 0x237   : > { %p721_p4 = scmp.ne.s32.totalorder %s887_s12, %s720_s22  ;;  %p725_p9 = scmp.lt.u32.totalorder %s887_s12, %s933_s5 }
 0x238   : > { %p726_p10 = scmp.lt.u32.totalorder %s724_s26, %s720_s22  ;;  %p728_p12 = scmp.lt.u32.totalorder %s720_s22, %s887_s12 }
 0x239   : > { %p722_p7 = pnand %p721_p4, %p843_p5 }
 0x23a   : > { %p727_p11 = por %p726_p10, %p725_p9 }
 0x23b   : > { %p723_p8 = pneg %p722_p7 }
 0x23c   : > { %p729_p13 = por %p728_p12, %p727_p11 }
 0x23e   : > { %p730_p0 = pnand %p729_p13, %p723_p8 }
 0x240   : > { %733 = shalt.err (!%p730_p0)
}
 0x241   : > { %659 = dma.vmem_to_hbm [thread:$0]  (%p843_p5), %s490_s8, 128, %s887_s12, %s473_s13  }
 0x242   : > { %s287_s11 = scalar_lea.vmem %s932_s4, %s864_s10 }
 0x307   : > { %v462_v23 = vpop.f32.mrb[0].mxu1 }
 0x308   : > { %466 = vst.msk [vmem:[%s287_s11] sm:$0xff] %vm293_vm1, %v462_v23  ;;  %v650_v24 = vpop.f32.mrb[1].mxu1 }
 0x309 PF: > { %p665_p1 = scmp.ge.s32.totalorder %s768_s21, 2  ;;  %s508_s14 = sand.u32 1, %s756_s18  }
 0x30a   : > { %s509_s28 = scalar_lea.sflag [#allocation3], %s508_s14 }
 0x30b   : > { %p662_p2 = pnand %p665_p1, %p847_p6 }
 0x30d   : > { %751 = dma.done.wait (!%p662_p2), %s509_s28, 128  }
 0x30e   : > { %753 = vsyncadd (!%p662_p2), %s509_s28, 4294967168  ;;  %p16_p5 = scmp.ge.s32.totalorder %s830_s24, 6   ;;  %s936_s18 = smov %s760_s19 }
 0x30f   : > { %s937_s19 = smov %s764_s20  ;;  %s938_s20 = smov %s841_s27 }
 0x310   : > { %s939_s21 = smov %s830_s24  ;;  %18 = sbr.rel (!%p16_p5) target bundleno = 3 (0x3), region = 92 }
 0x317   :  { %514 = vsyncpa [#allocation3], 1 }
 0x318   :  { %516 = vsyncpa [#allocation3 + $0x1], 1 }

// kernel: decoder_forward.29
= control target key start
LH: loop header
LB: loop body
LE: loop exit
PB: predicated region body
PF: predicated region fallthrough
CT: control target
= control target key end

     0   :  { %12 = vsyncpa [#allocation3], 0  ;;  %s947_s0 = inlined_call_operand.vmem [shape: f32[2,8,32], index: 0, kind: input, shape index: {}]   ;;  %s948_s1 = inlined_call_operand.vmem [shape: f32[32,64], index: 1, kind: input, shape index: {}]   ;;  %s949_s2 = inlined_call_operand.vmem [shape: f32[1,64], index: 2, kind: input, shape index: {}]   ;;  %s950_s3 = inlined_call_operand.vmem [shape: f32[64,32], index: 3, kind: input, shape index: {}]   ;;  %s951_s4 = inlined_call_operand.vmem [shape: f32[1,32], index: 4, kind: input, shape index: {}]   ;;  %s952_s5 = inlined_call_operand.vmem [shape: f32[1,32], index: 5, kind: input, shape index: {}]   ;;  %s953_s6 = inlined_call_operand.vmem [shape: f32[1,32], index: 6, kind: input, shape index: {}]   ;;  %s954_s7 = inlined_call_operand.hbm [shape: f32[2,8,32], index: 7, kind: output, shape index: {}]  }
   0x1   :  { %14 = vsyncpa [#allocation3 + $0x1], 0  ;;  %s795_s24 = smov 0   ;;  %s797_s25 = smov 0  }
   0x2   :  { %s799_s26 = smov 0   ;;  %s801_s27 = smov 0  }
   0x3 LB: > { %s816_s28 = sadd.s32 4294967295, %s749_s27   ;;  %s563_s29 = sadd.s32 4294967294, %s749_s27   ;;  %s749_s27 = sphi %s801_s27, %s960_s27   ;;  %s745_s26 = sphi %s799_s26, %s959_s26   ;;  %s741_s25 = sphi %s797_s25, %s958_s25   ;;  %s737_s24 = sphi %s795_s24, %s957_s24  }
   0x4   : > { %s820_s30 = sadd.s32 1, %s749_s27   ;;  %s179_s8 = sadd.s32 1, %s745_s26 }
   0x5   : > { %s176_s9 = ssub.s32 %s749_s27, %s820_s30  ;;  %p189_p0 = scmp.ne.s32.totalorder %s745_s26, %s741_s25 }
   0x6   : > { %p177_p1 = scmp.eq.s32.totalorder %s176_s9, 0  ;;  %p190_p2 = scmp.eq.s32.totalorder %s816_s28, 1 }
   0x7   : > { %p195_p3 = scmp.ne.s32.totalorder %s741_s25, %s737_s24  ;;  %p196_p4 = scmp.eq.s32.totalorder %s563_s29, 1 }
   0x8   : > { %s831_s10 = scalar_select %p177_p1, %s745_s26, %s179_s8  }
   0x9   : > { %p833_p5 = por %p190_p2, %p189_p0  ;;  %p837_p6 = por %p196_p4, %p195_p3 }
   0xa   : > { %p566_p7 = scmp.ge.s32.totalorder %s749_s27, 1  ;;  %p239_p8 = scmp.lt.s32.totalorder %s749_s27, 3 }
   0xc   : > { %p240_p9 = pnand %p566_p7, %p239_p8 }
   0xd   : > { %v275_v0 = vld [vmem:[%s948_s1] sm:$0xff] (!%p240_p9)  ;;  %v276_v1 = vld [vmem:[%s948_s1 + $0x8] sm:$0xff] (!%p240_p9)  ;;  %v277_v2 = vld [vmem:[%s948_s1 + $0x10] sm:$0xff] (!%p240_p9)  ;;  %v751_v3 = vmov (!%p240_p9), 0.0|0.0   ;;  %vm752_vm0 = vmmov (!%p240_p9), 0   ;;  %v753_v6 = vmov (!%p240_p9), 0.0  }
   0xe   : > { %243 = sbr.rel (%p240_p9) target bundleno = 808 (0x328), region = 48  ;;  %623 = vmatprep.subr.bf16.mxu0 (!%p240_p9), %v751_v3  ;;  %v624_v4 = vpack.c.bf16 (!%p240_p9), %v276_v1, %v275_v0  ;;  %v278_v5 = vld [vmem:[%s948_s1 + $0x18] sm:$0xff] (!%p240_p9)  ;;  %601 = vmatprep.mubr.msk.f32.mxu0 (!%p240_p9), %vm752_vm0, %v753_v6  ;;  %p270_p10 = scmp.lt.s32.totalorder (!%p240_p9), %s816_s28, 1  ;;  %vm286_vm1 = vcmask (!%p240_p9), 261120   ;;  %v369_v9 = vld [vmem:[%s950_s3] sm:$0xff] (!%p240_p9)  ;;  %v370_v10 = vld [vmem:[%s950_s3 + $0x8] sm:$0xff] (!%p240_p9) }
   0xf   : > { %629 = vmatprep.subr.bf16.mxu1 (!%p240_p9), %v751_v3  ;;  %620 = vmatprep.mubr.msk.f32.mxu1 (!%p240_p9), %vm752_vm0, %v753_v6  ;;  %v627_v7 = vpack.c.bf16 (!%p240_p9), %v278_v5, %v277_v2  ;;  %v371_v11 = vld [vmem:[%s950_s3 + $0x10] sm:$0xff] (!%p240_p9)  ;;  %v630_v12 = vpack.c.bf16 (!%p240_p9), %v370_v10, %v369_v9  ;;  %v372_v13 = vld [vmem:[%s950_s3 + $0x18] sm:$0xff] (!%p240_p9)  ;;  %v373_v15 = vld [vmem:[%s950_s3 + $0x20] sm:$0xff] (!%p240_p9)  ;;  %vm384_vm2 = vcmask (!%p240_p9), 523264   ;;  %s267_s18 = sand.u32 (!%p240_p9), 1, %s741_s25   ;;  %s576_s29 = sshll.u32 (!%p240_p9), %s816_s28, 7 }
  0x10   : > { %625 = vmatpush3.bf16.msra.mxu0 (!%p240_p9), %v624_v4  ;;  %v633_v14 = vpack.c.bf16 (!%p240_p9), %v372_v13, %v371_v11  ;;  %v374_v16 = vld [vmem:[%s950_s3 + $0x28] sm:$0xff] (!%p240_p9)  ;;  %v375_v18 = vld [vmem:[%s950_s3 + $0x30] sm:$0xff] (!%p240_p9)  ;;  %v376_v19 = vld [vmem:[%s950_s3 + $0x38] sm:$0xff] (!%p240_p9)  ;;  %s567_s19 = sshll.u32 (!%p240_p9), %s267_s18, 3  ;;  %s904_s15 = scalar_lea.hbm (!%p240_p9), %s954_s7, %s576_s29 }
  0x11   : > { %626 = vmatprep.subr.bf16.mxu0 (!%p240_p9), %v751_v3  ;;  %631 = vmatpush3.bf16.msra.mxu1 (!%p240_p9), %v630_v12  ;;  %v636_v17 = vpack.c.bf16 (!%p240_p9), %v374_v16, %v373_v15  ;;  %v639_v20 = vpack.c.bf16 (!%p240_p9), %v376_v19, %v375_v18  ;;  %v569_v21 = vld [vmem:[%s949_s2] ss:$0 sm:$0xff] (!%p240_p9)  ;;  %s491_s16 = scalar_lea.sflag (!%p240_p9), [#allocation3], %s267_s18 }
  0x12   : > { %632 = vmatprep.subr.bf16.mxu1 (!%p240_p9), %v751_v3  ;;  %v571_v34 = vld [vmem:[%s951_s4] ss:$0 sm:$0xff] (!%p240_p9) }
  0x13   : > { %v573_v49 = vld [vmem:[%s952_s5] ss:$0 sm:$0xff] (!%p240_p9) }
  0x14   : > { %628 = vmatpush3.bf16.msra.mxu0 (!%p240_p9), %v627_v7  ;;  %v574_v51 = vld [vmem:[%s953_s6] ss:$0 sm:$0xff] (!%p240_p9) }
  0x15   : > { %s271_s21 = scalar_select %p270_p10, %s816_s28, 1  ;;  %634 = vmatpush3.bf16.msra.mxu1 %v633_v14 }
  0x16   : > { %635 = vmatprep.subr.bf16.mxu1 %v751_v3  ;;  %s754_s28 = smov [#allocation2]  }
  0x17   : > { %s568_s22 = sshll.u32 %s271_s21, 3 }
  0x18   : > { %s273_s8 = scalar_lea.vmem %s947_s0, %s568_s22 }
  0x19   : > { %v274_v8 = vld [vmem:[%s273_s8] sm:$0xff]  ;;  %637 = vmatpush3.bf16.msra.mxu1 %v636_v17  ;;  %s269_s8 = scalar_lea.vmem [#allocation2], %s567_s19  ;;  %s691_s19 = sshll.u32 %s754_s28, 4  ;;  %s692_s19 = int_to_ptr.vmem [resolvable:$false] %s691_s19 }
  0x1a   : > { %602 = vmatmul.mubr.msk.f32.vlgmr.msra.gmra.mrb[0].mxu0 %vm286_vm1, %v274_v8  ;;  %638 = vmatprep.subr.bf16.mxu1 %v751_v3  ;;  %s504_s9 = sshll.u32 %s269_s8, 4  ;;  %s693_s20 = scalar_lea.vmem %s692_s19, 256  ;;  %s906_s9 = int_to_ptr.vmem [resolvable:$true] %s504_s9 }
  0x1b   : > { %s687_s17 = scalar_lea.vmem %s906_s9, 128  ;;  %p694_p0 = scmp.lt.s32.totalorder %s906_s9, %s692_s19 }
  0x1c   : > { %p688_p11 = scmp.ne.s32.totalorder %s906_s9, %s687_s17  ;;  %p695_p1 = scmp.lt.s32.totalorder %s693_s20, %s687_s17 }
  0x1d   : > { %640 = vmatpush3.bf16.msra.mxu1 %v639_v20 }
  0x1e   : > { %p689_p12 = pnand %p688_p11, %p833_p5  ;;  %p696_p2 = por %p695_p1, %p694_p0 }
  0x20   : > { %p690_p13 = pneg %p689_p12 }
  0x22   : > { %p697_p3 = pnand %p696_p2, %p690_p13 }
  0xed   : > { %v356_v22 = vpop.f32.mrb[0].mxu0 }
  0xee   : > { %v357_v23 = vadd.f32 %v569_v21, %v356_v22  ;;  %v603_v24 = vpop.f32.mrb[1].mxu0 }
  0xf0   : > { %v361_v25 = vmul.f32 0.044715, %v357_v23  ;;  %v360_v31 = vmul.f32 0.5, %v357_v23 }
  0xf2   : > { %v362_v26 = vmul.f32 %v361_v25, %v357_v23 }
  0xf4   : > { %v363_v27 = vmul.f32 %v362_v26, %v357_v23 }
  0xf6   : > { %v364_v28 = vadd.f32 %v363_v27, %v357_v23 }
  0xf8   : > { %v365_v29 = vmul.f32 0.7978846, %v364_v28 }
  0xfa   : > { %683 = vtanh.f32 %v365_v29 }
 0x104   : > { %v684_v30 = vpop.eup %683 }
 0x105   : > { %v367_v32 = vadd.f32 1.0, %v684_v30 }
 0x107   : > { %v368_v33 = vmul.f32 %v367_v32, %v360_v31 }
 0x109   : > { %621 = vmatmul.mubr.msk.f32.vlgmr.msra.gmra.mrb[0].mxu1 %vm384_vm2, %v368_v33 }
 0x1dc   : > { %v454_v35 = vpop.f32.mrb[0].mxu1 }
 0x1dd   : > { %v455_v36 = vadd.f32 %v571_v34, %v454_v35  ;;  %v622_v37 = vpop.f32.mrb[1].mxu1 }
 0x1df   : > { %v458_v38 = vadd.f32 %v455_v36, %v274_v8 }
 0x1e1   : > { %v461_v39 = vsel %vm286_vm1, %v458_v38, 0.0 }
 0x1e2   : > { %462 = vadd.xlane.f32.xlu0 %v461_v39 }
 0x26f   : > { %v463_v40 = vpop.xlane.xlu0 %462 }
 0x270   : > { %v465_v41 = vmul.f32 0.03125, %v463_v40 }
 0x272   : > { %v466_v42 = vsub.f32 %v458_v38, %v465_v41 }
 0x274   : > { %v467_v43 = vmul.f32 %v466_v42, %v466_v42 }
 0x276   : > { %v468_v44 = vsel %vm286_vm1, %v467_v43, 0.0 }
 0x277   : > { %469 = vadd.xlane.f32.xlu0 %v468_v44 }
 0x304   : > { %v470_v45 = vpop.xlane.xlu0 %469 }
 0x305   : > { %v471_v46 = vmul.f32 0.03125, %v470_v45 }
 0x307   : > { %v472_v47 = vadd.f32 1e-05, %v471_v46 }
 0x309   : > { %685 = vrsqrt.f32 %v472_v47 }
 0x313   : > { %v686_v48 = vpop.eup %685 }
 0x314   : > { %v474_v50 = vmul.f32 %v686_v48, %v466_v42 }
 0x316   : > { %v481_v52 = vmul.f32 %v573_v49, %v474_v50 }
 0x318   : > { %v488_v53 = vadd.f32 %v574_v51, %v481_v52 }
 0x31a   : > { %489 = vst.msk [vmem:[%s269_s8] sm:$0xff] %vm286_vm1, %v488_v53 }
 0x31b   : > { %700 = shalt.err (!%p697_p3)
}
 0x31c   : > { %s701_s18 = scalar_lea.hbm %s904_s15, 128  ;;  %s705_s23 = scalar_lea.hbm %s954_s7, 256 }
 0x31d   : > { %p702_p4 = scmp.ne.s32.totalorder %s904_s15, %s701_s18  ;;  %p706_p9 = scmp.lt.u32.totalorder %s904_s15, %s954_s7 }
 0x31e   : > { %p707_p10 = scmp.lt.u32.totalorder %s705_s23, %s701_s18  ;;  %p709_p12 = scmp.lt.u32.totalorder %s701_s18, %s904_s15 }
 0x31f   : > { %p703_p7 = pnand %p702_p4, %p833_p5 }
 0x320   : > { %p708_p11 = por %p707_p10, %p706_p9 }
 0x321   : > { %p704_p8 = pneg %p703_p7 }
 0x322   : > { %p710_p13 = por %p709_p12, %p708_p11 }
 0x324   : > { %p711_p0 = pnand %p710_p13, %p704_p8 }
 0x326   : > { %714 = shalt.err (!%p711_p0)
}
 0x327   : > { %641 = dma.vmem_to_hbm [thread:$0]  (%p833_p5), %s906_s9, 128, %s904_s15, %s491_s16  }
 0x328 PF: > { %p647_p1 = scmp.ge.s32.totalorder %s749_s27, 2  ;;  %s516_s13 = sand.u32 1, %s737_s24  }
 0x329   : > { %s517_s14 = scalar_lea.sflag [#allocation3], %s516_s13 }
 0x32a   : > { %p644_p2 = pnand %p647_p1, %p837_p6 }
 0x32c   : > { %732 = dma.done.wait (!%p644_p2), %s517_s14, 128  }
 0x32d   : > { %734 = vsyncadd (!%p644_p2), %s517_s14, 4294967168  ;;  %p17_p3 = scmp.ge.s32.totalorder %s820_s30, 4   ;;  %s957_s24 = smov %s741_s25 }
 0x32e   : > { %s958_s25 = smov %s745_s26  ;;  %s959_s26 = smov %s831_s10 }
 0x32f   : > { %s960_s27 = smov %s820_s30  ;;  %19 = sbr.rel (!%p17_p3) target bundleno = 3 (0x3), region = 83 }
 0x336   :  { %522 = vsyncpa [#allocation3], 1 }
 0x337   :  { %524 = vsyncpa [#allocation3 + $0x1], 1 }

// kernel: decoder_forward.22
= control target key start
LH: loop header
LB: loop body
LE: loop exit
PB: predicated region body
PF: predicated region fallthrough
CT: control target
= control target key end

     0   :  { %s686_s24 = smov 0   ;;  %s762_s0 = inlined_call_operand.vmem [shape: f32[2,8,32], index: 0, kind: input, shape index: {}]   ;;  %s763_s1 = inlined_call_operand.vmem [shape: f32[32,64], index: 1, kind: input, shape index: {}]   ;;  %s764_s2 = inlined_call_operand.vmem [shape: f32[1,64], index: 2, kind: input, shape index: {}]   ;;  %s765_s3 = inlined_call_operand.vmem [shape: f32[64,32], index: 3, kind: input, shape index: {}]   ;;  %s766_s4 = inlined_call_operand.vmem [shape: f32[1,32], index: 4, kind: input, shape index: {}]   ;;  %s767_s5 = inlined_call_operand.vmem [shape: f32[1,32], index: 5, kind: input, shape index: {}]   ;;  %s768_s6 = inlined_call_operand.vmem [shape: f32[1,32], index: 6, kind: input, shape index: {}]   ;;  %s769_s7 = inlined_call_operand.vmem [shape: f32[2,8,32], index: 7, kind: output, shape index: {}]  }
   0x1 LB: > { %s543_s25 = sadd.s32 4294967295, %s641_s24   ;;  %p547_p0 = scmp.ge.s32.totalorder %s641_s24, 1  ;;  %s641_s24 = sphi %s686_s24, %s17_s24  }
   0x2   : > { %p236_p1 = scmp.lt.s32.totalorder %s641_s24, 3 }
   0x4   : > { %p237_p2 = pnand %p547_p0, %p236_p1 }
   0x5   : > { %v275_v0 = vld [vmem:[%s763_s1] sm:$0xff] (!%p237_p2)  ;;  %v276_v1 = vld [vmem:[%s763_s1 + $0x8] sm:$0xff] (!%p237_p2)  ;;  %v277_v2 = vld [vmem:[%s763_s1 + $0x10] sm:$0xff] (!%p237_p2)  ;;  %v643_v3 = vmov (!%p237_p2), 0.0|0.0   ;;  %vm644_vm0 = vmmov (!%p237_p2), 0   ;;  %v645_v6 = vmov (!%p237_p2), 0.0  }
   0x6   : > { %240 = sbr.rel (%p237_p2) target bundleno = 786 (0x312), region = 48  ;;  %602 = vmatprep.subr.bf16.mxu0 (!%p237_p2), %v643_v3  ;;  %v603_v4 = vpack.c.bf16 (!%p237_p2), %v276_v1, %v275_v0  ;;  %v278_v5 = vld [vmem:[%s763_s1 + $0x18] sm:$0xff] (!%p237_p2)  ;;  %580 = vmatprep.mubr.msk.f32.mxu0 (!%p237_p2), %vm644_vm0, %v645_v6  ;;  %p266_p3 = scmp.lt.s32.totalorder (!%p237_p2), %s543_s25, 1  ;;  %vm286_vm1 = vcmask (!%p237_p2), 261120   ;;  %v369_v9 = vld [vmem:[%s765_s3] sm:$0xff] (!%p237_p2)  ;;  %v370_v10 = vld [vmem:[%s765_s3 + $0x8] sm:$0xff] (!%p237_p2) }
   0x7   : > { %608 = vmatprep.subr.bf16.mxu1 (!%p237_p2), %v643_v3  ;;  %599 = vmatprep.mubr.msk.f32.mxu1 (!%p237_p2), %vm644_vm0, %v645_v6  ;;  %v606_v7 = vpack.c.bf16 (!%p237_p2), %v278_v5, %v277_v2  ;;  %v371_v11 = vld [vmem:[%s765_s3 + $0x10] sm:$0xff] (!%p237_p2)  ;;  %v609_v12 = vpack.c.bf16 (!%p237_p2), %v370_v10, %v369_v9  ;;  %v372_v13 = vld [vmem:[%s765_s3 + $0x18] sm:$0xff] (!%p237_p2)  ;;  %v373_v15 = vld [vmem:[%s765_s3 + $0x20] sm:$0xff] (!%p237_p2)  ;;  %vm384_vm2 = vcmask (!%p237_p2), 523264  }
   0x8   : > { %604 = vmatpush3.bf16.msra.mxu0 (!%p237_p2), %v603_v4  ;;  %v612_v14 = vpack.c.bf16 (!%p237_p2), %v372_v13, %v371_v11  ;;  %v374_v16 = vld [vmem:[%s765_s3 + $0x28] sm:$0xff] (!%p237_p2)  ;;  %v375_v18 = vld [vmem:[%s765_s3 + $0x30] sm:$0xff] (!%p237_p2)  ;;  %v376_v19 = vld [vmem:[%s765_s3 + $0x38] sm:$0xff] (!%p237_p2) }
   0x9   : > { %605 = vmatprep.subr.bf16.mxu0 (!%p237_p2), %v643_v3  ;;  %610 = vmatpush3.bf16.msra.mxu1 (!%p237_p2), %v609_v12  ;;  %v615_v17 = vpack.c.bf16 (!%p237_p2), %v374_v16, %v373_v15  ;;  %v618_v20 = vpack.c.bf16 (!%p237_p2), %v376_v19, %v375_v18  ;;  %v550_v21 = vld [vmem:[%s764_s2] ss:$0 sm:$0xff] (!%p237_p2) }
   0xa   : > { %611 = vmatprep.subr.bf16.mxu1 (!%p237_p2), %v643_v3  ;;  %v552_v34 = vld [vmem:[%s766_s4] ss:$0 sm:$0xff] (!%p237_p2) }
   0xb   : > { %v554_v49 = vld [vmem:[%s767_s5] ss:$0 sm:$0xff] (!%p237_p2) }
   0xc   : > { %607 = vmatpush3.bf16.msra.mxu0 (!%p237_p2), %v606_v7  ;;  %v555_v51 = vld [vmem:[%s768_s6] ss:$0 sm:$0xff] (!%p237_p2) }
   0xd   : > { %s771_s25 = smov (!%p266_p3, %s543_s25), 1  ;;  %613 = vmatpush3.bf16.msra.mxu1 %v612_v14 }
   0xe   : > { %s548_s11 = sshll.u32 %s771_s25, 3  ;;  %614 = vmatprep.subr.bf16.mxu1 %v643_v3 }
   0xf   : > { %s269_s14 = scalar_lea.vmem %s762_s0, %s548_s11  ;;  %s273_s21 = scalar_lea.vmem %s769_s7, %s548_s11 }
  0x10   : > { %v274_v8 = vld [vmem:[%s269_s14] sm:$0xff] }
  0x11   : > { %581 = vmatmul.mubr.msk.f32.vlgmr.msra.gmra.mrb[0].mxu0 %vm286_vm1, %v274_v8  ;;  %616 = vmatpush3.bf16.msra.mxu1 %v615_v17 }
  0x12   : > { %617 = vmatprep.subr.bf16.mxu1 %v643_v3 }
  0x15   : > { %619 = vmatpush3.bf16.msra.mxu1 %v618_v20 }
  0xe4   : > { %v356_v22 = vpop.f32.mrb[0].mxu0 }
  0xe5   : > { %v357_v23 = vadd.f32 %v550_v21, %v356_v22  ;;  %v582_v24 = vpop.f32.mrb[1].mxu0 }
  0xe7   : > { %v361_v25 = vmul.f32 0.044715, %v357_v23  ;;  %v360_v31 = vmul.f32 0.5, %v357_v23 }
  0xe9   : > { %v362_v26 = vmul.f32 %v361_v25, %v357_v23 }
  0xeb   : > { %v363_v27 = vmul.f32 %v362_v26, %v357_v23 }
  0xed   : > { %v364_v28 = vadd.f32 %v363_v27, %v357_v23 }
  0xef   : > { %v365_v29 = vmul.f32 0.7978846, %v364_v28 }
  0xf1   : > { %631 = vtanh.f32 %v365_v29 }
  0xfb   : > { %v632_v30 = vpop.eup %631 }
  0xfc   : > { %v367_v32 = vadd.f32 1.0, %v632_v30 }
  0xfe   : > { %v368_v33 = vmul.f32 %v367_v32, %v360_v31 }
 0x100   : > { %600 = vmatmul.mubr.msk.f32.vlgmr.msra.gmra.mrb[0].mxu1 %vm384_vm2, %v368_v33 }
 0x1d3   : > { %v454_v35 = vpop.f32.mrb[0].mxu1 }
 0x1d4   : > { %v455_v36 = vadd.f32 %v552_v34, %v454_v35  ;;  %v601_v37 = vpop.f32.mrb[1].mxu1 }
 0x1d6   : > { %v458_v38 = vadd.f32 %v455_v36, %v274_v8 }
 0x1d8   : > { %v461_v39 = vsel %vm286_vm1, %v458_v38, 0.0 }
 0x1d9   : > { %462 = vadd.xlane.f32.xlu0 %v461_v39 }
 0x266   : > { %v463_v40 = vpop.xlane.xlu0 %462 }
 0x267   : > { %v465_v41 = vmul.f32 0.03125, %v463_v40 }
 0x269   : > { %v466_v42 = vsub.f32 %v458_v38, %v465_v41 }
 0x26b   : > { %v467_v43 = vmul.f32 %v466_v42, %v466_v42 }
 0x26d   : > { %v468_v44 = vsel %vm286_vm1, %v467_v43, 0.0 }
 0x26e   : > { %469 = vadd.xlane.f32.xlu0 %v468_v44 }
 0x2fb   : > { %v470_v45 = vpop.xlane.xlu0 %469 }
 0x2fc   : > { %v471_v46 = vmul.f32 0.03125, %v470_v45 }
 0x2fe   : > { %v472_v47 = vadd.f32 1e-05, %v471_v46 }
 0x300   : > { %633 = vrsqrt.f32 %v472_v47 }
 0x30a   : > { %v634_v48 = vpop.eup %633 }
 0x30b   : > { %v474_v50 = vmul.f32 %v634_v48, %v466_v42 }
 0x30d   : > { %v481_v52 = vmul.f32 %v554_v49, %v474_v50 }
 0x30f   : > { %v488_v53 = vadd.f32 %v555_v51, %v481_v52 }
 0x311   : > { %489 = vst.msk [vmem:[%s273_s21] sm:$0xff] %vm286_vm1, %v488_v53 }
 0x312 PF: > { %s17_s24 = sadd.s32 1, %s641_s24  }
 0x313   : > { %p14_p4 = scmp.ge.s32.totalorder %s17_s24, 4  }
 0x315   :  { %16 = sbr.rel (!%p14_p4) target bundleno = 1 (0x1), region = 78 }

</bundles_post_ra>
